<compile_context>
chip_gen: v6e
topology: v6e:2x2x1
jax: 0.10.0
libtpu: 0.0.40
codegen_flags: <defaults>
</compile_context>

<pallas_src>
import math

import jax
import jax.numpy as jnp
import numpy as np
from jax.experimental import pallas as pl

# ---- model constants (from the PyTorch script) ------------------------------
EMBEDDING_DIM = 50
NUM_CLASSES = 2
NUM_LAYERS = 3
SEQ_LEN = 20
VOCAB_SIZE = 1000
BATCH = 2

EP = 128            # lane-dense padded embedding width (zero padding is exact)
NEG_PAD = -1e30     # bias of padded classifier lanes (exp underflows to 0)


# ---- Pallas kernel -----------------------------------------------------------
def self_attention_kernel(x_ref, w_ref, c_ref, pool_ref, out_ref):
    """Single grid-less invocation; everything (<0.4 MiB) is VMEM-resident.

    x_ref    : (B*S, EP)      embedded tokens + positional encoding
    w_ref    : (L+3, EP, EP)  [attw_0..attw_{L-1}, f0w, g0w, linw (padded)]
    c_ref    : (B*S+L+3, EP)  [segment-0 mask, att biases, f0b, g0b, linb]
    pool_ref : (B, B*S)       per-batch mean-pool matrix (1/S baked in)
    out_ref  : (B, EP)        lane-dense log-softmax (first NUM_CLASSES valid)
    """
    BS = x_ref.shape[0]
    L = w_ref.shape[0] - 3

    x = x_ref[...]                                    # (BS, EP)
    mask0 = c_ref[0:BS, :]                            # 1.0 on batch-0 rows
    inv_mask0 = 1.0 - mask0                           # hoisted out of the loop
    f0w = w_ref[L]
    g0w = w_ref[L + 1]
    f0b = c_ref[BS + L:BS + L + 1, :]
    g0b = c_ref[BS + L + 1:BS + L + 2, :]

    for i in range(L):
        # attention_weights = softmax(Linear_i(x), dim=seq), per batch segment
        logits = (jnp.dot(x, w_ref[i], preferred_element_type=jnp.float32)
                  + c_ref[BS + i:BS + i + 1, :])
        # One global per-column max is exact for softmax (per-column shift
        # invariance); logits are O(1) here so neither segment can underflow.
        m = jnp.max(logits, axis=0, keepdims=True)            # (1, EP)
        e = jnp.exp(logits - m)                                # (BS, EP)
        d0 = jnp.sum(e * mask0, axis=0, keepdims=True)         # batch-0 denom
        d1 = jnp.sum(e, axis=0, keepdims=True) - d0            # batch-1 denom
        # EUP reciprocal on the two (1, EP) rows, broadcast via the mask select
        r = (mask0 * pl.reciprocal(d0, approx=True)
             + inv_mask0 * pl.reciprocal(d1, approx=True))
        aw = e * r

        # x = x + f0(aw * x);  x = relu(g0(x))
        x = x + jnp.dot(aw * x, f0w, preferred_element_type=jnp.float32) + f0b
        x = jnp.dot(x, g0w, preferred_element_type=jnp.float32) + g0b
        x = jnp.maximum(x, 0.0)

    # ---- mean pool per batch: (B, BS) pooling matmul, 1/S folded in ---------
    xm = jnp.dot(pool_ref[...], x, preferred_element_type=jnp.float32)  # (B,EP)

    # ---- classifier + log-softmax (padded classes carry NEG_PAD -> exp==0) --
    cls = (jnp.dot(xm, w_ref[L + 2], preferred_element_type=jnp.float32)
           + c_ref[BS + L + 2:BS + L + 3, :])
    mx = jnp.max(cls, axis=1, keepdims=True)
    lse = jnp.log(jnp.sum(jnp.exp(cls - mx), axis=1, keepdims=True)) + mx
    out_ref[...] = cls - lse


def self_attention_forward(tokens, emb_table, pe_full, w_stack, consts, pool):
    """Embedding gather (XLA) + one fused Pallas kernel for the rest."""
    B, S = tokens.shape
    BS = B * S
    E = emb_table.shape[1]
    rows = jnp.take(emb_table, tokens.reshape(BS), axis=0)      # (BS, E)
    x0 = jnp.pad(rows, ((0, 0), (0, EP - E))) + pe_full         # (BS, EP)
    out_pad = pl.pallas_call(
        self_attention_kernel,
        out_shape=jax.ShapeDtypeStruct((B, EP), jnp.float32),
    )(x0, w_stack, consts, pool)
    return out_pad[:, :NUM_CLASSES]


# ---- parameter construction (deterministic, synthetic) -----------------------
def make_params(key):
    ks = jax.random.split(key, 8)
    E, C, L, V = EMBEDDING_DIM, NUM_CLASSES, NUM_LAYERS, VOCAB_SIZE

    def linear_init(k, fan_in, shape):
        bound = 1.0 / math.sqrt(fan_in)
        return jax.random.uniform(k, shape, jnp.float32, -bound, bound)

    emb_table = jax.random.normal(ks[0], (V, E), jnp.float32)
    attw = linear_init(ks[1], E, (L, E, E))        # (in, out) layout
    attb = linear_init(ks[2], E, (L, 1, E))
    f0w = linear_init(ks[3], E, (E, E))
    f0b = linear_init(ks[3], E, (1, E))
    g0w = linear_init(ks[4], E, (E, E))
    g0b = linear_init(ks[4], E, (1, E))
    linw = linear_init(ks[5], E, (E, C))
    linb = linear_init(ks[5], E, (1, C))
    return emb_table, attw, attb, f0w, f0b, g0w, g0b, linw, linb


def make_positional_encoding(max_len, d_model):
    pe = np.zeros((max_len, d_model), np.float32)
    position = np.arange(0, max_len, dtype=np.float32)[:, None]
    div_term = np.exp(np.arange(0, d_model, 2, dtype=np.float32)
                      * (-math.log(10000.0) / d_model))
    pe[:, 0::2] = np.sin(position * div_term)
    pe[:, 1::2] = np.cos(position * div_term)
    return jnp.asarray(pe)


def pack_params(emb_table, pe, attw, attb, f0w, f0b, g0w, g0b, linw, linb,
                batch):
    """One-time setup: lane-pad E->EP, stack weights, pack constants.

    Zero lane padding is exact (padded channels stay identically zero through
    every layer).  The kernel's two-segment softmax select assumes batch == 2.
    """
    assert batch == 2, "kernel's two-segment softmax select assumes batch == 2"
    E = emb_table.shape[1]
    L = attw.shape[0]
    C = linw.shape[1]
    S = pe.shape[0]
    BS = batch * S
    pc = EP - E

    # stacked weights: [attw_0..attw_{L-1}, f0w, g0w, linw] -> (L+3, EP, EP)
    attw_p = jnp.pad(attw, ((0, 0), (0, pc), (0, pc)))
    f0w_p = jnp.pad(f0w, ((0, pc), (0, pc)))[None]
    g0w_p = jnp.pad(g0w, ((0, pc), (0, pc)))[None]
    linw_p = jnp.pad(linw, ((0, pc), (0, EP - C)))[None]
    w_stack = jnp.concatenate([attw_p, f0w_p, g0w_p, linw_p], axis=0)

    # packed constant plane (BS + L + 3, EP):
    #   rows [0, BS)       : segment-0 mask (1.0 on batch-0 rows)
    #   rows [BS, BS+L)    : attention biases
    #   rows BS+L, BS+L+1  : f0 / g0 biases
    #   row  BS+L+2        : classifier bias, padded classes set to NEG_PAD
    mask0 = jnp.broadcast_to(
        (jnp.arange(BS) < S).astype(jnp.float32)[:, None], (BS, EP))
    attb_p = jnp.pad(attb.reshape(L, E), ((0, 0), (0, pc)))
    f0b_p = jnp.pad(f0b, ((0, 0), (0, pc)))
    g0b_p = jnp.pad(g0b, ((0, 0), (0, pc)))
    linb_p = jnp.concatenate(
        [linb, jnp.full((1, EP - C), NEG_PAD, jnp.float32)], axis=1)
    consts = jnp.concatenate([mask0, attb_p, f0b_p, g0b_p, linb_p], axis=0)

    # mean-pool matrix with 1/S folded in: (B, BS)
    r = jnp.arange(batch)[:, None]
    c = jnp.arange(BS)[None, :]
    pool = jnp.where((c >= r * S) & (c < (r + 1) * S),
                     jnp.float32(1.0 / S), jnp.float32(0.0))

    # positional encoding, lane-padded and pre-tiled over the batch
    pe_full = jnp.tile(jnp.pad(pe, ((0, 0), (0, pc))), (batch, 1))  # (BS, EP)

    return pe_full, w_stack, consts, pool


# ---- pure-JAX reference for correctness check --------------------------------
def reference_forward(tokens, emb_table, pe, attw, attb, f0w, f0b, g0w, g0b,
                      linw, linb):
    x = jnp.take(emb_table, tokens, axis=0) + pe[None]            # (B, S, E)
    for i in range(attw.shape[0]):
        logits = jnp.einsum("bse,ef->bsf", x, attw[i]) + attb[i][None]
        aw = jax.nn.softmax(logits, axis=1)                       # over seq
        x = x + jnp.einsum("bse,ef->bsf", aw * x, f0w) + f0b[None]
        x = jnp.einsum("bse,ef->bsf", x, g0w) + g0b[None]
        x = jnp.maximum(x, 0.0)
    xm = jnp.mean(x, axis=1)                                      # (B, E)
    cls = xm @ linw + linb
    return jax.nn.log_softmax(cls, axis=1)


# ---- main --------------------------------------------------------------------
if __name__ == "__main__":
    key = jax.random.PRNGKey(0)
    k_tok, k_par = jax.random.split(key)

    tokens = jax.random.randint(k_tok, (BATCH, SEQ_LEN), 0, VOCAB_SIZE,
                                dtype=jnp.int32)
    (emb_table, attw, attb, f0w, f0b, g0w, g0b, linw, linb) = make_params(k_par)
    pe = make_positional_encoding(SEQ_LEN, EMBEDDING_DIM)

    # one-time setup: stacked / packed, lane-dense parameters for the kernel
    pe_full, w_stack, consts, pool = pack_params(
        emb_table, pe, attw, attb, f0w, f0b, g0w, g0b, linw, linb, BATCH)

    fwd = jax.jit(self_attention_forward)
    out = jax.block_until_ready(
        fwd(tokens, emb_table, pe_full, w_stack, consts, pool))

    ref = reference_forward(tokens, emb_table, pe, attw, attb, f0w, f0b,
                            g0w, g0b, linw, linb)
    # tolerance accommodates the EUP approximate reciprocal used for the
    # in-kernel softmax denominators (structural bugs would be >> 1e-2)
    np.testing.assert_allclose(np.asarray(out), np.asarray(ref),
                               rtol=2e-3, atol=2e-3)

    print("KERNEL_OK")
</pallas_src>

<mosaic_0001>
module attributes {stable_mosaic.version = 11 : i64} {
  func.func @self_attention_kernel(%arg0: memref<40x128xf32, #tpu.memory_space<vmem>>, %arg1: memref<6x128x128xf32, #tpu.memory_space<vmem>>, %arg2: memref<46x128xf32, #tpu.memory_space<vmem>>, %arg3: memref<2x40xf32, #tpu.memory_space<vmem>>, %arg4: memref<2x128xf32, #tpu.memory_space<vmem>>) attributes {dimension_semantics = [], scalar_prefetch = 0 : i64, scratch_operands = 0 : i64, tpu.core_type = #tpu.core_type<tc>} {
    %c0 = arith.constant 0 : index
    %c0_0 = arith.constant 0 : index
    %0 = vector.load %arg0[%c0, %c0_0] : memref<40x128xf32, #tpu.memory_space<vmem>>, vector<40x128xf32>
    %c0_1 = arith.constant 0 : index
    %c0_2 = arith.constant 0 : index
    %1 = vector.load %arg2[%c0_1, %c0_2] : memref<46x128xf32, #tpu.memory_space<vmem>>, vector<40x128xf32>
    %cst = arith.constant 1.000000e+00 : f32
    %2 = vector.broadcast %cst : f32 to vector<40x128xf32>
    %3 = arith.subf %2, %1 : vector<40x128xf32>
    %c3 = arith.constant 3 : index
    %c0_3 = arith.constant 0 : index
    %c0_4 = arith.constant 0 : index
    %4 = vector.load %arg1[%c3, %c0_3, %c0_4] : memref<6x128x128xf32, #tpu.memory_space<vmem>>, vector<1x128x128xf32>
    %5 = vector.shape_cast %4 : vector<1x128x128xf32> to vector<128x128xf32>
    %c4 = arith.constant 4 : index
    %c0_5 = arith.constant 0 : index
    %c0_6 = arith.constant 0 : index
    %6 = vector.load %arg1[%c4, %c0_5, %c0_6] : memref<6x128x128xf32, #tpu.memory_space<vmem>>, vector<1x128x128xf32>
    %7 = vector.shape_cast %6 : vector<1x128x128xf32> to vector<128x128xf32>
    %c43 = arith.constant 43 : index
    %c0_7 = arith.constant 0 : index
    %8 = vector.load %arg2[%c43, %c0_7] : memref<46x128xf32, #tpu.memory_space<vmem>>, vector<1x128xf32>
    %c44 = arith.constant 44 : index
    %c0_8 = arith.constant 0 : index
    %9 = vector.load %arg2[%c44, %c0_8] : memref<46x128xf32, #tpu.memory_space<vmem>>, vector<1x128xf32>
    %c0_9 = arith.constant 0 : index
    %c0_10 = arith.constant 0 : index
    %c0_11 = arith.constant 0 : index
    %10 = vector.load %arg1[%c0_9, %c0_10, %c0_11] : memref<6x128x128xf32, #tpu.memory_space<vmem>>, vector<1x128x128xf32>
    %11 = vector.shape_cast %10 : vector<1x128x128xf32> to vector<128x128xf32>
    %cst_12 = arith.constant dense<0.000000e+00> : vector<40x128xf32>
    %12 = tpu.matmul %0, %11, %cst_12 {dimension_numbers = #tpu.dot_dimension_numbers<[1], [0], [0], [1], [0, 0, 1, 1], [], []>} : vector<40x128xf32>, vector<128x128xf32>, vector<40x128xf32> -> vector<40x128xf32>
    %c40 = arith.constant 40 : index
    %c0_13 = arith.constant 0 : index
    %13 = vector.load %arg2[%c40, %c0_13] : memref<46x128xf32, #tpu.memory_space<vmem>>, vector<1x128xf32>
    %14 = vector.broadcast %13 : vector<1x128xf32> to vector<40x128xf32>
    %15 = arith.addf %12, %14 : vector<40x128xf32>
    %cst_14 = arith.constant dense<0xFF800000> : vector<128xf32>
    %16 = vector.multi_reduction <maximumf>, %15, %cst_14 [0] : vector<40x128xf32> to vector<128xf32>
    %17 = vector.shape_cast %16 : vector<128xf32> to vector<1x128xf32>
    %18 = vector.broadcast %17 : vector<1x128xf32> to vector<40x128xf32>
    %19 = arith.subf %15, %18 : vector<40x128xf32>
    %20 = math.exp %19 : vector<40x128xf32>
    %21 = arith.mulf %20, %1 : vector<40x128xf32>
    %cst_15 = arith.constant dense<0.000000e+00> : vector<128xf32>
    %22 = vector.multi_reduction <add>, %21, %cst_15 [0] : vector<40x128xf32> to vector<128xf32>
    %23 = vector.shape_cast %22 : vector<128xf32> to vector<1x128xf32>
    %cst_16 = arith.constant dense<0.000000e+00> : vector<128xf32>
    %24 = vector.multi_reduction <add>, %20, %cst_16 [0] : vector<40x128xf32> to vector<128xf32>
    %25 = vector.shape_cast %24 : vector<128xf32> to vector<1x128xf32>
    %26 = arith.subf %25, %23 : vector<1x128xf32>
    %27 = tpu.reciprocal %23 {approx = true} : vector<1x128xf32> -> vector<1x128xf32>
    %28 = vector.broadcast %27 : vector<1x128xf32> to vector<40x128xf32>
    %29 = arith.mulf %1, %28 : vector<40x128xf32>
    %30 = tpu.reciprocal %26 {approx = true} : vector<1x128xf32> -> vector<1x128xf32>
    %31 = vector.broadcast %30 : vector<1x128xf32> to vector<40x128xf32>
    %32 = arith.mulf %3, %31 : vector<40x128xf32>
    %33 = arith.addf %29, %32 : vector<40x128xf32>
    %34 = arith.mulf %20, %33 : vector<40x128xf32>
    %35 = arith.mulf %34, %0 : vector<40x128xf32>
    %cst_17 = arith.constant dense<0.000000e+00> : vector<40x128xf32>
    %36 = tpu.matmul %35, %5, %cst_17 {dimension_numbers = #tpu.dot_dimension_numbers<[1], [0], [0], [1], [0, 0, 1, 1], [], []>} : vector<40x128xf32>, vector<128x128xf32>, vector<40x128xf32> -> vector<40x128xf32>
    %37 = arith.addf %0, %36 : vector<40x128xf32>
    %38 = vector.broadcast %8 : vector<1x128xf32> to vector<40x128xf32>
    %39 = arith.addf %37, %38 : vector<40x128xf32>
    %cst_18 = arith.constant dense<0.000000e+00> : vector<40x128xf32>
    %40 = tpu.matmul %39, %7, %cst_18 {dimension_numbers = #tpu.dot_dimension_numbers<[1], [0], [0], [1], [0, 0, 1, 1], [], []>} : vector<40x128xf32>, vector<128x128xf32>, vector<40x128xf32> -> vector<40x128xf32>
    %41 = vector.broadcast %9 : vector<1x128xf32> to vector<40x128xf32>
    %42 = arith.addf %40, %41 : vector<40x128xf32>
    %cst_19 = arith.constant 0.000000e+00 : f32
    %43 = vector.broadcast %cst_19 : f32 to vector<40x128xf32>
    %44 = arith.maximumf %42, %43 : vector<40x128xf32>
    %c1 = arith.constant 1 : index
    %c0_20 = arith.constant 0 : index
    %c0_21 = arith.constant 0 : index
    %45 = vector.load %arg1[%c1, %c0_20, %c0_21] : memref<6x128x128xf32, #tpu.memory_space<vmem>>, vector<1x128x128xf32>
    %46 = vector.shape_cast %45 : vector<1x128x128xf32> to vector<128x128xf32>
    %cst_22 = arith.constant dense<0.000000e+00> : vector<40x128xf32>
    %47 = tpu.matmul %44, %46, %cst_22 {dimension_numbers = #tpu.dot_dimension_numbers<[1], [0], [0], [1], [0, 0, 1, 1], [], []>} : vector<40x128xf32>, vector<128x128xf32>, vector<40x128xf32> -> vector<40x128xf32>
    %c41 = arith.constant 41 : index
    %c0_23 = arith.constant 0 : index
    %48 = vector.load %arg2[%c41, %c0_23] : memref<46x128xf32, #tpu.memory_space<vmem>>, vector<1x128xf32>
    %49 = vector.broadcast %48 : vector<1x128xf32> to vector<40x128xf32>
    %50 = arith.addf %47, %49 : vector<40x128xf32>
    %cst_24 = arith.constant dense<0xFF800000> : vector<128xf32>
    %51 = vector.multi_reduction <maximumf>, %50, %cst_24 [0] : vector<40x128xf32> to vector<128xf32>
    %52 = vector.shape_cast %51 : vector<128xf32> to vector<1x128xf32>
    %53 = vector.broadcast %52 : vector<1x128xf32> to vector<40x128xf32>
    %54 = arith.subf %50, %53 : vector<40x128xf32>
    %55 = math.exp %54 : vector<40x128xf32>
    %56 = arith.mulf %55, %1 : vector<40x128xf32>
    %cst_25 = arith.constant dense<0.000000e+00> : vector<128xf32>
    %57 = vector.multi_reduction <add>, %56, %cst_25 [0] : vector<40x128xf32> to vector<128xf32>
    %58 = vector.shape_cast %57 : vector<128xf32> to vector<1x128xf32>
    %cst_26 = arith.constant dense<0.000000e+00> : vector<128xf32>
    %59 = vector.multi_reduction <add>, %55, %cst_26 [0] : vector<40x128xf32> to vector<128xf32>
    %60 = vector.shape_cast %59 : vector<128xf32> to vector<1x128xf32>
    %61 = arith.subf %60, %58 : vector<1x128xf32>
    %62 = tpu.reciprocal %58 {approx = true} : vector<1x128xf32> -> vector<1x128xf32>
    %63 = vector.broadcast %62 : vector<1x128xf32> to vector<40x128xf32>
    %64 = arith.mulf %1, %63 : vector<40x128xf32>
    %65 = tpu.reciprocal %61 {approx = true} : vector<1x128xf32> -> vector<1x128xf32>
    %66 = vector.broadcast %65 : vector<1x128xf32> to vector<40x128xf32>
    %67 = arith.mulf %3, %66 : vector<40x128xf32>
    %68 = arith.addf %64, %67 : vector<40x128xf32>
    %69 = arith.mulf %55, %68 : vector<40x128xf32>
    %70 = arith.mulf %69, %44 : vector<40x128xf32>
    %cst_27 = arith.constant dense<0.000000e+00> : vector<40x128xf32>
    %71 = tpu.matmul %70, %5, %cst_27 {dimension_numbers = #tpu.dot_dimension_numbers<[1], [0], [0], [1], [0, 0, 1, 1], [], []>} : vector<40x128xf32>, vector<128x128xf32>, vector<40x128xf32> -> vector<40x128xf32>
    %72 = arith.addf %44, %71 : vector<40x128xf32>
    %73 = vector.broadcast %8 : vector<1x128xf32> to vector<40x128xf32>
    %74 = arith.addf %72, %73 : vector<40x128xf32>
    %cst_28 = arith.constant dense<0.000000e+00> : vector<40x128xf32>
    %75 = tpu.matmul %74, %7, %cst_28 {dimension_numbers = #tpu.dot_dimension_numbers<[1], [0], [0], [1], [0, 0, 1, 1], [], []>} : vector<40x128xf32>, vector<128x128xf32>, vector<40x128xf32> -> vector<40x128xf32>
    %76 = vector.broadcast %9 : vector<1x128xf32> to vector<40x128xf32>
    %77 = arith.addf %75, %76 : vector<40x128xf32>
    %cst_29 = arith.constant 0.000000e+00 : f32
    %78 = vector.broadcast %cst_29 : f32 to vector<40x128xf32>
    %79 = arith.maximumf %77, %78 : vector<40x128xf32>
    %c2 = arith.constant 2 : index
    %c0_30 = arith.constant 0 : index
    %c0_31 = arith.constant 0 : index
    %80 = vector.load %arg1[%c2, %c0_30, %c0_31] : memref<6x128x128xf32, #tpu.memory_space<vmem>>, vector<1x128x128xf32>
    %81 = vector.shape_cast %80 : vector<1x128x128xf32> to vector<128x128xf32>
    %cst_32 = arith.constant dense<0.000000e+00> : vector<40x128xf32>
    %82 = tpu.matmul %79, %81, %cst_32 {dimension_numbers = #tpu.dot_dimension_numbers<[1], [0], [0], [1], [0, 0, 1, 1], [], []>} : vector<40x128xf32>, vector<128x128xf32>, vector<40x128xf32> -> vector<40x128xf32>
    %c42 = arith.constant 42 : index
    %c0_33 = arith.constant 0 : index
    %83 = vector.load %arg2[%c42, %c0_33] : memref<46x128xf32, #tpu.memory_space<vmem>>, vector<1x128xf32>
    %84 = vector.broadcast %83 : vector<1x128xf32> to vector<40x128xf32>
    %85 = arith.addf %82, %84 : vector<40x128xf32>
    %cst_34 = arith.constant dense<0xFF800000> : vector<128xf32>
    %86 = vector.multi_reduction <maximumf>, %85, %cst_34 [0] : vector<40x128xf32> to vector<128xf32>
    %87 = vector.shape_cast %86 : vector<128xf32> to vector<1x128xf32>
    %88 = vector.broadcast %87 : vector<1x128xf32> to vector<40x128xf32>
    %89 = arith.subf %85, %88 : vector<40x128xf32>
    %90 = math.exp %89 : vector<40x128xf32>
    %91 = arith.mulf %90, %1 : vector<40x128xf32>
    %cst_35 = arith.constant dense<0.000000e+00> : vector<128xf32>
    %92 = vector.multi_reduction <add>, %91, %cst_35 [0] : vector<40x128xf32> to vector<128xf32>
    %93 = vector.shape_cast %92 : vector<128xf32> to vector<1x128xf32>
    %cst_36 = arith.constant dense<0.000000e+00> : vector<128xf32>
    %94 = vector.multi_reduction <add>, %90, %cst_36 [0] : vector<40x128xf32> to vector<128xf32>
    %95 = vector.shape_cast %94 : vector<128xf32> to vector<1x128xf32>
    %96 = arith.subf %95, %93 : vector<1x128xf32>
    %97 = tpu.reciprocal %93 {approx = true} : vector<1x128xf32> -> vector<1x128xf32>
    %98 = vector.broadcast %97 : vector<1x128xf32> to vector<40x128xf32>
    %99 = arith.mulf %1, %98 : vector<40x128xf32>
    %100 = tpu.reciprocal %96 {approx = true} : vector<1x128xf32> -> vector<1x128xf32>
    %101 = vector.broadcast %100 : vector<1x128xf32> to vector<40x128xf32>
    %102 = arith.mulf %3, %101 : vector<40x128xf32>
    %103 = arith.addf %99, %102 : vector<40x128xf32>
    %104 = arith.mulf %90, %103 : vector<40x128xf32>
    %105 = arith.mulf %104, %79 : vector<40x128xf32>
    %cst_37 = arith.constant dense<0.000000e+00> : vector<40x128xf32>
    %106 = tpu.matmul %105, %5, %cst_37 {dimension_numbers = #tpu.dot_dimension_numbers<[1], [0], [0], [1], [0, 0, 1, 1], [], []>} : vector<40x128xf32>, vector<128x128xf32>, vector<40x128xf32> -> vector<40x128xf32>
    %107 = arith.addf %79, %106 : vector<40x128xf32>
    %108 = vector.broadcast %8 : vector<1x128xf32> to vector<40x128xf32>
    %109 = arith.addf %107, %108 : vector<40x128xf32>
    %cst_38 = arith.constant dense<0.000000e+00> : vector<40x128xf32>
    %110 = tpu.matmul %109, %7, %cst_38 {dimension_numbers = #tpu.dot_dimension_numbers<[1], [0], [0], [1], [0, 0, 1, 1], [], []>} : vector<40x128xf32>, vector<128x128xf32>, vector<40x128xf32> -> vector<40x128xf32>
    %111 = vector.broadcast %9 : vector<1x128xf32> to vector<40x128xf32>
    %112 = arith.addf %110, %111 : vector<40x128xf32>
    %cst_39 = arith.constant 0.000000e+00 : f32
    %113 = vector.broadcast %cst_39 : f32 to vector<40x128xf32>
    %114 = arith.maximumf %112, %113 : vector<40x128xf32>
    %c0_40 = arith.constant 0 : index
    %c0_41 = arith.constant 0 : index
    %115 = vector.load %arg3[%c0_40, %c0_41] : memref<2x40xf32, #tpu.memory_space<vmem>>, vector<2x40xf32>
    %cst_42 = arith.constant dense<0.000000e+00> : vector<2x128xf32>
    %116 = tpu.matmul %115, %114, %cst_42 {dimension_numbers = #tpu.dot_dimension_numbers<[1], [0], [0], [1], [0, 0, 1, 1], [], []>} : vector<2x40xf32>, vector<40x128xf32>, vector<2x128xf32> -> vector<2x128xf32>
    %c5 = arith.constant 5 : index
    %c0_43 = arith.constant 0 : index
    %c0_44 = arith.constant 0 : index
    %117 = vector.load %arg1[%c5, %c0_43, %c0_44] : memref<6x128x128xf32, #tpu.memory_space<vmem>>, vector<1x128x128xf32>
    %118 = vector.shape_cast %117 : vector<1x128x128xf32> to vector<128x128xf32>
    %cst_45 = arith.constant dense<0.000000e+00> : vector<2x128xf32>
    %119 = tpu.matmul %116, %118, %cst_45 {dimension_numbers = #tpu.dot_dimension_numbers<[1], [0], [0], [1], [0, 0, 1, 1], [], []>} : vector<2x128xf32>, vector<128x128xf32>, vector<2x128xf32> -> vector<2x128xf32>
    %c45 = arith.constant 45 : index
    %c0_46 = arith.constant 0 : index
    %120 = vector.load %arg2[%c45, %c0_46] : memref<46x128xf32, #tpu.memory_space<vmem>>, vector<1x128xf32>
    %121 = vector.broadcast %120 : vector<1x128xf32> to vector<2x128xf32>
    %122 = arith.addf %119, %121 : vector<2x128xf32>
    %cst_47 = arith.constant dense<0xFF800000> : vector<2xf32>
    %123 = vector.multi_reduction <maximumf>, %122, %cst_47 [1] : vector<2x128xf32> to vector<2xf32>
    %124 = vector.shape_cast %123 : vector<2xf32> to vector<2x1xf32>
    %125 = vector.broadcast %124 : vector<2x1xf32> to vector<2x128xf32>
    %126 = arith.subf %122, %125 : vector<2x128xf32>
    %127 = math.exp %126 : vector<2x128xf32>
    %cst_48 = arith.constant dense<0.000000e+00> : vector<2xf32>
    %128 = vector.multi_reduction <add>, %127, %cst_48 [1] : vector<2x128xf32> to vector<2xf32>
    %129 = vector.shape_cast %128 : vector<2xf32> to vector<2x1xf32>
    %130 = math.log %129 : vector<2x1xf32>
    %131 = arith.addf %130, %124 : vector<2x1xf32>
    %132 = vector.broadcast %131 : vector<2x1xf32> to vector<2x128xf32>
    %133 = arith.subf %122, %132 : vector<2x128xf32>
    %c0_49 = arith.constant 0 : index
    %c0_50 = arith.constant 0 : index
    %134 = vector.load %arg4[%c0_49, %c0_50] : memref<2x128xf32, #tpu.memory_space<vmem>>, vector<2x128xf32>
    tpu.vector_store %arg4[%c0_49, %c0_50], %133 {strides = array<i32>} : memref<2x128xf32, #tpu.memory_space<vmem>>, vector<2x128xf32>,
    return
  }
}

</mosaic_0001>

<bundles_post_ra>
// kernel: self_attention_forward.1
= control target key start
LH: loop header
LB: loop body
LE: loop exit
PB: predicated region body
PF: predicated region fallthrough
CT: control target
= control target key end

     0   :  { %v3337_v1 = vmov 0.0   ;;  %vm2304_vm0 = vmmov 0   ;;  %s3332_s0 = inlined_call_operand.vmem [shape: f32[40,128], index: 0, kind: input, shape index: {}]   ;;  %s3333_s1 = inlined_call_operand.vmem [shape: f32[6,128,128], index: 1, kind: input, shape index: {}]   ;;  %s3334_s2 = inlined_call_operand.vmem [shape: f32[46,128], index: 2, kind: input, shape index: {}]   ;;  %s3335_s3 = inlined_call_operand.vmem [shape: f32[2,40], index: 3, kind: input, shape index: {}]   ;;  %s3336_s4 = inlined_call_operand.hbm [shape: f32[2,128], index: 4, kind: output, shape index: {}]  }
   0x1   :  { %v84_v0 = vld [vmem:[%s3333_s1 + $0x78] sm:$0xff]  ;;  %1726 = vmatprep.subr.mxu0 %v3337_v1  ;;  %v83_v2 = vld [vmem:[%s3333_s1 + $0x70] sm:$0xff]  ;;  %1758 = vmatprep.mubr.msk.f32.mxu0 %vm2304_vm0, %v3337_v1  ;;  %v82_v3 = vld [vmem:[%s3333_s1 + $0x68] sm:$0xff] }
   0x2   :  { %1727 = vmatpush3.msra.mxu0 %v84_v0  ;;  %1773 = vmatprep.subr.mxu1 %v3337_v1  ;;  %v81_v4 = vld [vmem:[%s3333_s1 + $0x60] sm:$0xff]  ;;  %v80_v5 = vld [vmem:[%s3333_s1 + $0x58] sm:$0xff] }
   0x3   :  { %1728 = vmatprep.subr.mxu0 %v3337_v1  ;;  %1805 = vmatprep.mubr.msk.f32.mxu1 %vm2304_vm0, %v3337_v1 }
   0x4   :  { %1729 = vmatpush3.msra.mxu0 %v83_v2 }
   0x5   :  { %1730 = vmatprep.subr.mxu0 %v3337_v1 }
   0x6   :  { %1731 = vmatpush3.msra.mxu0 %v82_v3 }
   0x7   :  { %1732 = vmatprep.subr.mxu0 %v3337_v1 }
   0x8   :  { %9 = vsyncpa [#allocation3], 0  ;;  %1733 = vmatpush3.msra.mxu0 %v81_v4  ;;  %v79_v6 = vld [vmem:[%s3333_s1 + $0x50] sm:$0xff]  ;;  %v78_v7 = vld [vmem:[%s3333_s1 + $0x48] sm:$0xff]  ;;  %vm1232_vm1 = vcmask 326656   ;;  %vm1398_vm2 = vcmask 1041408  }
   0x9   :  { %1734 = vmatprep.subr.mxu0 %v3337_v1  ;;  %v77_v8 = vld [vmem:[%s3333_s1 + $0x40] sm:$0xff]  ;;  %v76_v9 = vld [vmem:[%s3333_s1 + $0x38] sm:$0xff]  ;;  %v75_v10 = vld [vmem:[%s3333_s1 + $0x30] sm:$0xff] }
   0xa   :  { %1735 = vmatpush3.msra.mxu0 %v80_v5  ;;  %v74_v11 = vld [vmem:[%s3333_s1 + $0x28] sm:$0xff]  ;;  %v73_v12 = vld [vmem:[%s3333_s1 + $0x20] sm:$0xff]  ;;  %v72_v13 = vld [vmem:[%s3333_s1 + $0x18] sm:$0xff] }
   0xb   :  { %1736 = vmatprep.subr.mxu0 %v3337_v1  ;;  %v71_v14 = vld [vmem:[%s3333_s1 + $0x10] sm:$0xff]  ;;  %v70_v15 = vld [vmem:[%s3333_s1 + $0x8] sm:$0xff]  ;;  %v69_v16 = vld [vmem:[%s3333_s1] sm:$0xff] }
   0xc   :  { %1737 = vmatpush3.msra.mxu0 %v79_v6  ;;  %v2402_v17 = vld [vmem:[%s3332_s0] sm:$0xff]  ;;  %v2412_v18 = vld [vmem:[%s3332_s0 + $0x8] sm:$0xff]  ;;  %v2420_v19 = vld [vmem:[%s3332_s0 + $0x10] sm:$0xff] }
   0xd   :  { %1738 = vmatprep.subr.mxu0 %v3337_v1  ;;  %v2428_v20 = vld [vmem:[%s3332_s0 + $0x18] sm:$0xff]  ;;  %v2436_v21 = vld [vmem:[%s3332_s0 + $0x20] sm:$0xff]  ;;  %v2450_v23 = vld [vmem:[%s3333_s1 + $0x1f0] sm:$0xff] }
   0xe   :  { %1739 = vmatpush3.msra.mxu0 %v78_v7  ;;  %v2444_v22 = vld [vmem:[%s3333_s1 + $0x1f8] sm:$0xff]  ;;  %v2456_v24 = vld [vmem:[%s3333_s1 + $0x1e8] sm:$0xff]  ;;  %v2463_v25 = vld [vmem:[%s3333_s1 + $0x1e0] sm:$0xff] }
   0xf   :  { %1740 = vmatprep.subr.mxu0 %v3337_v1  ;;  %1774 = vmatpush3.msra.mxu1 %v2444_v22  ;;  %v2470_v26 = vld [vmem:[%s3333_s1 + $0x1d8] sm:$0xff]  ;;  %v2477_v27 = vld [vmem:[%s3333_s1 + $0x1d0] sm:$0xff]  ;;  %v2484_v28 = vld [vmem:[%s3333_s1 + $0x1c8] sm:$0xff] }
  0x10   :  { %1741 = vmatpush3.msra.mxu0 %v77_v8  ;;  %1775 = vmatprep.subr.mxu1 %v3337_v1  ;;  %v2491_v29 = vld [vmem:[%s3333_s1 + $0x1c0] sm:$0xff]  ;;  %v2498_v30 = vld [vmem:[%s3333_s1 + $0x1b8] sm:$0xff]  ;;  %v2505_v31 = vld [vmem:[%s3333_s1 + $0x1b0] sm:$0xff] }
  0x11   :  { %1742 = vmatprep.subr.mxu0 %v3337_v1  ;;  %1776 = vmatpush3.msra.mxu1 %v2450_v23  ;;  %v2512_v32 = vld [vmem:[%s3333_s1 + $0x1a8] sm:$0xff]  ;;  %v2519_v33 = vld [vmem:[%s3333_s1 + $0x1a0] sm:$0xff]  ;;  %v2526_v34 = vld [vmem:[%s3333_s1 + $0x198] sm:$0xff] }
  0x12   :  { %1743 = vmatpush3.msra.mxu0 %v76_v9  ;;  %1777 = vmatprep.subr.mxu1 %v3337_v1  ;;  %v2533_v35 = vld [vmem:[%s3333_s1 + $0x190] sm:$0xff]  ;;  %v2540_v36 = vld [vmem:[%s3333_s1 + $0x188] sm:$0xff]  ;;  %v2547_v37 = vld [vmem:[%s3333_s1 + $0x180] sm:$0xff] }
  0x13   :  { %1744 = vmatprep.subr.mxu0 %v3337_v1  ;;  %1778 = vmatpush3.msra.mxu1 %v2456_v24  ;;  %v2556_v38 = vld [vmem:[%s3333_s1 + $0x278] sm:$0xff]  ;;  %v2561_v39 = vld [vmem:[%s3333_s1 + $0x270] sm:$0xff]  ;;  %v2568_v40 = vld [vmem:[%s3333_s1 + $0x268] sm:$0xff] }
  0x14   :  { %1745 = vmatpush3.msra.mxu0 %v75_v10  ;;  %1779 = vmatprep.subr.mxu1 %v3337_v1  ;;  %v2575_v41 = vld [vmem:[%s3333_s1 + $0x260] sm:$0xff]  ;;  %v2582_v42 = vld [vmem:[%s3333_s1 + $0x258] sm:$0xff]  ;;  %v2589_v43 = vld [vmem:[%s3333_s1 + $0x250] sm:$0xff] }
  0x15   :  { %1746 = vmatprep.subr.mxu0 %v3337_v1  ;;  %1780 = vmatpush3.msra.mxu1 %v2463_v25  ;;  %v2596_v45 = vld [vmem:[%s3333_s1 + $0x248] sm:$0xff]  ;;  %v2603_v47 = vld [vmem:[%s3333_s1 + $0x240] sm:$0xff]  ;;  %v2610_v49 = vld [vmem:[%s3333_s1 + $0x238] sm:$0xff] }
  0x16   :  { %1747 = vmatpush3.msra.mxu0 %v74_v11  ;;  %1781 = vmatprep.subr.mxu1 %v3337_v1  ;;  %v2617_v51 = vld [vmem:[%s3333_s1 + $0x230] sm:$0xff]  ;;  %v2624_v53 = vld [vmem:[%s3333_s1 + $0x228] sm:$0xff]  ;;  %v2631_v55 = vld [vmem:[%s3333_s1 + $0x220] sm:$0xff] }
  0x17   :  { %1748 = vmatprep.subr.mxu0 %v3337_v1  ;;  %1782 = vmatpush3.msra.mxu1 %v2470_v26  ;;  %3341 = vst [vmem:[#allocation5_spill] sm:$0xff] %v2631_v55  ;;  %v2638_v57 = vld [vmem:[%s3333_s1 + $0x218] sm:$0xff]  ;;  %v1459_v58 = vld [vmem:[%s3334_s2 + $0x28] ss:$0 sm:$0xff] }
  0x18   :  { %1749 = vmatpush3.msra.mxu0 %v73_v12  ;;  %1783 = vmatprep.subr.mxu1 %v3337_v1  ;;  %3342 = vst [vmem:[#allocation6_spill] sm:$0xff] %v2638_v57 }
  0x19   :  { %1750 = vmatprep.subr.mxu0 %v3337_v1  ;;  %1784 = vmatpush3.msra.mxu1 %v2477_v27 }
  0x1a   :  { %1751 = vmatpush3.msra.mxu0 %v72_v13  ;;  %1785 = vmatprep.subr.mxu1 %v3337_v1 }
  0x1b   :  { %1752 = vmatprep.subr.mxu0 %v3337_v1  ;;  %1786 = vmatpush3.msra.mxu1 %v2484_v28 }
  0x1c   :  { %1753 = vmatpush3.msra.mxu0 %v71_v14  ;;  %1787 = vmatprep.subr.mxu1 %v3337_v1 }
  0x1d   :  { %1754 = vmatprep.subr.mxu0 %v3337_v1  ;;  %1788 = vmatpush3.msra.mxu1 %v2491_v29 }
  0x1e   :  { %1755 = vmatpush3.msra.mxu0 %v70_v15  ;;  %1789 = vmatprep.subr.mxu1 %v3337_v1 }
  0x1f   :  { %1756 = vmatprep.subr.mxu0 %v3337_v1  ;;  %1790 = vmatpush3.msra.mxu1 %v2498_v30 }
  0x20   :  { %1757 = vmatpush3.msra.mxu0 %v69_v16  ;;  %1791 = vmatprep.subr.mxu1 %v3337_v1 }
  0x21   :  { %1759 = vmatmul.mubr.f32.vlgmr.msra.gmra.mxu0 %v2402_v17  ;;  %1820 = vmatprep.subr.mxu0 %v3337_v1 }
  0x22   :  { %1761 = vmatprep.mubr.msk.f32.mxu0 %vm2304_vm0, %v3337_v1  ;;  %1792 = vmatpush3.msra.mxu1 %v2505_v31 }
  0x23   :  { %1793 = vmatprep.subr.mxu1 %v3337_v1  ;;  %1821 = vmatpush3.msra.mxu0 %v2556_v38 }
  0x24   :  { %1794 = vmatpush3.msra.mxu1 %v2512_v32  ;;  %1822 = vmatprep.subr.mxu0 %v3337_v1 }
  0x25   :  { %1762 = vmatmul.mubr.f32.gmra.mxu0 %v2412_v18  ;;  %1795 = vmatprep.subr.mxu1 %v3337_v1 }
  0x26   :  { %1764 = vmatprep.mubr.msk.f32.mxu0 %vm2304_vm0, %v3337_v1  ;;  %1796 = vmatpush3.msra.mxu1 %v2519_v33 }
  0x27   :  { %1797 = vmatprep.subr.mxu1 %v3337_v1  ;;  %1823 = vmatpush3.msra.mxu0 %v2561_v39 }
  0x28   :  { %1798 = vmatpush3.msra.mxu1 %v2526_v34  ;;  %1824 = vmatprep.subr.mxu0 %v3337_v1 }
  0x29   :  { %1765 = vmatmul.mubr.f32.gmra.mxu0 %v2420_v19  ;;  %1799 = vmatprep.subr.mxu1 %v3337_v1 }
  0x2a   :  { %1767 = vmatprep.mubr.msk.f32.mxu0 %vm2304_vm0, %v3337_v1  ;;  %1800 = vmatpush3.msra.mxu1 %v2533_v35 }
  0x2b   :  { %1801 = vmatprep.subr.mxu1 %v3337_v1  ;;  %1825 = vmatpush3.msra.mxu0 %v2568_v40 }
  0x2c   :  { %1802 = vmatpush3.msra.mxu1 %v2540_v36  ;;  %1826 = vmatprep.subr.mxu0 %v3337_v1 }
  0x2d   :  { %1768 = vmatmul.mubr.f32.gmra.mxu0 %v2428_v20  ;;  %1803 = vmatprep.subr.mxu1 %v3337_v1 }
  0x2e   :  { %1770 = vmatprep.mubr.msk.f32.mxu0 %vm2304_vm0, %v3337_v1  ;;  %1804 = vmatpush3.msra.mxu1 %v2547_v37 }
  0x2f   :  { %1867 = vmatprep.subr.mxu1 %v3337_v1  ;;  %1827 = vmatpush3.msra.mxu0 %v2575_v41 }
  0x30   :  { %1828 = vmatprep.subr.mxu0 %v3337_v1 }
  0x31   :  { %1771 = vmatmul.mubr.f32.gmra.mxu0 %v2436_v21 }
  0x32   :  { %1852 = vmatprep.mubr.msk.f32.mxu0 %vm2304_vm0, %v3337_v1  ;;  %1829 = vmatpush3.msra.mxu0 %v2582_v42 }
  0x33   :  { %1830 = vmatprep.subr.mxu0 %v3337_v1 }
  0x34   :  { %1831 = vmatpush3.msra.mxu0 %v2589_v43 }
  0x35   :  { %1832 = vmatprep.subr.mxu0 %v3337_v1 }
  0x36   :  { %1833 = vmatpush3.msra.mxu0 %v2596_v45 }
  0x37   :  { %1834 = vmatprep.subr.mxu0 %v3337_v1 }
  0x38   :  { %1835 = vmatpush3.msra.mxu0 %v2603_v47 }
  0x39   :  { %1836 = vmatprep.subr.mxu0 %v3337_v1 }
  0x3a   :  { %1837 = vmatpush3.msra.mxu0 %v2610_v49 }
  0x3b   :  { %1838 = vmatprep.subr.mxu0 %v3337_v1 }
  0x3c   :  { %1839 = vmatpush3.msra.mxu0 %v2617_v51 }
  0x3d   :  { %1840 = vmatprep.subr.mxu0 %v3337_v1 }
  0x3e   :  { %1841 = vmatpush3.msra.mxu0 %v2624_v53 }
  0x3f   :  { %1842 = vmatprep.subr.mxu0 %v3337_v1 }
  0x40   :  { %1843 = vmatpush3.msra.mxu0 %v2631_v55 }
  0x41   :  { %1844 = vmatprep.subr.mxu0 %v3337_v1 }
  0x42   :  { %1845 = vmatpush3.msra.mxu0 %v2638_v57 }
  0x43   :  { %1846 = vmatprep.subr.mxu0 %v3337_v1 }
  0xe1   :  { %v156_v44 = vpop.f32.mrf.mxu0 }
  0xe2   :  { %v157_v61 = vadd.f32 %v1459_v58, %v156_v44 }
  0xe3   :  { %v1760_v46 = vpop.f32.mrf.mxu0 }
  0xe5   :  { %v161_v48 = vpop.f32.mrf.mxu0 }
  0xe6   :  { %v162_v2 = vadd.f32 %v1459_v58, %v161_v48 }
  0xe7   :  { %v1763_v50 = vpop.f32.mrf.mxu0 }
  0xe9   :  { %v166_v52 = vpop.f32.mrf.mxu0 }
  0xea   :  { %v167_v3 = vadd.f32 %v1459_v58, %v166_v52 }
  0xeb   :  { %v1766_v54 = vpop.f32.mrf.mxu0 }
  0xed   :  { %v171_v56 = vpop.f32.mrf.mxu0 }
  0xee   :  { %v172_v62 = vadd.f32 %v1459_v58, %v171_v56 }
  0xef   :  { %v1769_v59 = vpop.f32.mrf.mxu0 }
  0xf0   :  { %v182_v5 = vmax.f32 %v167_v3, %v172_v62  ;;  %v2655_v59 = vld [vmem:[%s3334_s2 + $0x8] sm:$0xff] }
  0xf1   :  { %v176_v60 = vpop.f32.mrf.mxu0 }
  0xf2   :  { %v177_v63 = vadd.f32 %v1459_v58, %v176_v60  ;;  %v2650_v58 = vld [vmem:[%s3334_s2] sm:$0xff] }
  0xf3   :  { %v1772_v0 = vpop.f32.mrf.mxu0 }
  0xf4   :  { %v180_v4 = vmax.f32 %v157_v61, %v177_v63 }
  0xf6   :  { %v181_v6 = vmax.f32 %v180_v4, %v162_v2 }
  0xf8   :  { %v183_v7 = vmax.f32 %v181_v6, %v182_v5  ;;  %v2667_v5 = vld [vmem:[%s3334_s2 + $0x18] sm:$0xff] }
  0xfa   :  { %v184_v8 = vrot.slane %v183_v7, 4 }
  0xfc   :  { %v185_v9 = vmax.f32 %v183_v7, %v184_v8 }
  0xfe   :  { %v186_v10 = vrot.slane %v185_v9, 2 }
 0x100   :  { %v187_v11 = vmax.f32 %v185_v9, %v186_v10  ;;  %v2673_v10 = vld [vmem:[%s3334_s2 + $0x20] sm:$0xff] }
 0x102   :  { %v188_v12 = vrot.slane %v187_v11, 1 }
 0x104   :  { %v189_v13 = vmax.f32 %v187_v11, %v188_v12 }
 0x106   :  { %v190_v14 = vsub.f32 %v157_v61, %v189_v13  ;;  %v191_v15 = vsub.f32 %v162_v2, %v189_v13  ;;  %v192_v16 = vsub.f32 %v167_v3, %v189_v13  ;;  %v193_v46 = vsub.f32 %v172_v62, %v189_v13  ;;  %v2660_v62 = vld [vmem:[%s3334_s2 + $0x10] sm:$0xff] }
 0x107   :  { %v194_v44 = vsub.f32 %v177_v63, %v189_v13 }
 0x108   :  { %v195_v50 = vmul.f32 1.442695, %v190_v14  ;;  %v197_v54 = vmul.f32 1.442695, %v191_v15  ;;  %v199_v56 = vmul.f32 1.442695, %v192_v16 }
 0x109   :  { %v201_v48 = vmul.f32 1.442695, %v193_v46  ;;  %v203_v52 = vmul.f32 1.442695, %v194_v44 }
 0x10a   :  { %2200 = vpow2.f32 %v195_v50 }
 0x10b   :  { %2202 = vpow2.f32 %v197_v54 }
 0x10c   :  { %2204 = vpow2.f32 %v199_v56 }
 0x10d   :  { %2206 = vpow2.f32 %v201_v48 }
 0x10e   :  { %2208 = vpow2.f32 %v203_v52 }
 0x117   :  { %v2201_v60 = vpop.eup %2200 }
 0x118   :  { %v2203_v61 = vpop.eup %2202  ;;  %v205_v63 = vmul.f32 %v2201_v60, %v2650_v58 }
 0x119   :  { %v2205_v0 = vpop.eup %2204  ;;  %v220_v2 = vadd.f32 %v2203_v61, %v2201_v60  ;;  %v206_v3 = vmul.f32 %v2203_v61, %v2655_v59 }
 0x11a   :  { %v2207_v4 = vpop.eup %2206  ;;  %v207_v7 = vmul.f32 %v2205_v0, %v2660_v62 }
 0x11b   :  { %v221_v6 = vadd.f32 %v2205_v0, %v220_v2  ;;  %v210_v8 = vadd.f32 %v206_v3, %v205_v63  ;;  %v2209_v9 = vpop.eup %2208  ;;  %v208_v12 = vmul.f32 %v2207_v4, %v2667_v5 }
 0x11c   :  { %v209_v14 = vmul.f32 %v2209_v9, %v2673_v10 }
 0x11d   :  { %v222_v11 = vadd.f32 %v2207_v4, %v221_v6  ;;  %v211_v13 = vadd.f32 %v210_v8, %v207_v7  ;;  %v2678_v7 = vsub.f32 1.0, %v2650_v58  ;;  %v2681_v8 = vsub.f32 1.0, %v2655_v59 }
 0x11f   :  { %v223_v15 = vadd.f32 %v2209_v9, %v222_v11  ;;  %v212_v16 = vadd.f32 %v211_v13, %v208_v12  ;;  %v2684_v12 = vsub.f32 1.0, %v2660_v62 }
 0x121   :  { %v224_v46 = vrot.slane %v223_v15, 4  ;;  %v213_v44 = vadd.f32 %v212_v16, %v209_v14 }
 0x123   :  { %v225_v50 = vadd.f32 %v224_v46, %v223_v15  ;;  %v214_v54 = vrot.slane %v213_v44, 4 }
 0x125   :  { %v226_v56 = vrot.slane %v225_v50, 2  ;;  %v215_v48 = vadd.f32 %v214_v54, %v213_v44  ;;  %v2692_v44 = vsub.f32 1.0, %v2667_v5 }
 0x127   :  { %v227_v52 = vadd.f32 %v226_v56, %v225_v50  ;;  %v216_v63 = vrot.slane %v215_v48, 2  ;;  %v2696_v56 = vsub.f32 1.0, %v2673_v10 }
 0x129   :  { %v228_v2 = vrot.slane %v227_v52, 1  ;;  %v217_v3 = vadd.f32 %v216_v63, %v215_v48 }
 0x12b   :  { %v218_v1 = vrot.slane %v217_v3, 1  ;;  %v229_v57 = vadd.f32 %v228_v2, %v227_v52 }
 0x12d   :  { %v219_v6 = vadd.f32 %v218_v1, %v217_v3 }
 0x12f   :  { %v230_v55 = vsub.f32 %v229_v57, %v219_v6  ;;  %2210 = vrcp.f32 %v219_v6  ;;  %v3343_v6 = vmov 0.0  }
 0x131   :  { %2212 = vrcp.f32 %v230_v55 }
 0x13c   :  { %v2211_v11 = vpop.eup %2210 }
 0x13d   :  { %v232_v14 = vmul.f32 %v2211_v11, %v2650_v58  ;;  %v233_v1 = vmul.f32 %v2211_v11, %v2655_v59  ;;  %v234_v54 = vmul.f32 %v2211_v11, %v2660_v62  ;;  %v235_v3 = vmul.f32 %v2211_v11, %v2667_v5 }
 0x13e   :  { %v2213_v13 = vpop.eup %2212 }
 0x13f   :  { %v238_v15 = vmul.f32 %v2213_v13, %v2678_v7  ;;  %v239_v57 = vmul.f32 %v2213_v13, %v2681_v8  ;;  %v240_v46 = vmul.f32 %v2213_v13, %v2684_v12  ;;  %v241_v2 = vmul.f32 %v2213_v13, %v2692_v44 }
 0x141   :  { %v243_v55 = vadd.f32 %v238_v15, %v232_v14  ;;  %v244_v16 = vadd.f32 %v239_v57, %v233_v1  ;;  %v245_v63 = vadd.f32 %v240_v46, %v234_v54  ;;  %v246_v15 = vadd.f32 %v241_v2, %v235_v3  ;;  %v1476_v54 = vld [vmem:[%s3333_s1 + $0xf0] sm:$0xff]  ;;  %v1471_v3 = vld [vmem:[%s3333_s1 + $0xc8] sm:$0xff] }
 0x142   :  { %v242_v1 = vmul.f32 %v2213_v13, %v2696_v56  ;;  %v236_v57 = vmul.f32 %v2211_v11, %v2673_v10  ;;  %v2734_v13 = vld [vmem:[%s3333_s1 + $0x200] sm:$0xff]  ;;  %v1472_v2 = vld [vmem:[%s3333_s1 + $0xd0] sm:$0xff] }
 0x143   :  { %v248_v50 = vmul.f32 %v2201_v60, %v243_v55  ;;  %v249_v52 = vmul.f32 %v2203_v61, %v244_v16  ;;  %v250_v60 = vmul.f32 %v2205_v0, %v245_v63  ;;  %v251_v55 = vmul.f32 %v2207_v4, %v246_v15  ;;  %v2720_v4 = vld [vmem:[%s3333_s1 + $0x210] sm:$0xff]  ;;  %v1473_v63 = vld [vmem:[%s3333_s1 + $0xd8] sm:$0xff] }
 0x144   :  { %v247_v16 = vadd.f32 %v242_v1, %v236_v57  ;;  %1847 = vmatpush3.msra.mxu0 %v2720_v4  ;;  %v1468_v15 = vld [vmem:[%s3333_s1 + $0xb0] sm:$0xff]  ;;  %v1467_v1 = vld [vmem:[%s3333_s1 + $0xa8] sm:$0xff]  ;;  %v1466_v57 = vld [vmem:[%s3333_s1 + $0xa0] sm:$0xff] }
 0x145   :  { %v253_v48 = vmul.f32 %v248_v50, %v2402_v17  ;;  %v254_v14 = vmul.f32 %v249_v52, %v2412_v18  ;;  %v255_v61 = vmul.f32 %v250_v60, %v2420_v19  ;;  %v256_v46 = vmul.f32 %v251_v55, %v2428_v20  ;;  %1848 = vmatprep.subr.mxu0 %v3343_v6  ;;  %v1477_v50 = vld [vmem:[%s3333_s1 + $0xf8] sm:$0xff]  ;;  %v1474_v52 = vld [vmem:[%s3333_s1 + $0xe0] sm:$0xff]  ;;  %v2793_v55 = vld [vmem:[%s3334_s2 + $0x2b] ss:$0 sm:$0xff] }
 0x146   :  { %v252_v0 = vmul.f32 %v2209_v9, %v247_v16  ;;  %v2726_v9 = vld [vmem:[%s3333_s1 + $0x208] sm:$0xff]  ;;  %v1469_v60 = vld [vmem:[%s3333_s1 + $0xb8] sm:$0xff] }
 0x147   :  { %1806 = vmatmul.mubr.f32.vlgmr.msra.gmra.mxu1 %v253_v48  ;;  %1849 = vmatpush3.msra.mxu0 %v2726_v9  ;;  %v1475_v48 = vld [vmem:[%s3333_s1 + $0xe8] sm:$0xff] }
 0x148   :  { %1808 = vmatprep.mubr.msk.f32.mxu1 %vm2304_vm0, %v3343_v6  ;;  %v257_v11 = vmul.f32 %v252_v0, %v2436_v21  ;;  %1850 = vmatprep.subr.mxu0 %v3343_v6 }
 0x149   :  { %1851 = vmatpush3.msra.mxu0 %v2734_v13  ;;  %1868 = vmatpush3.msra.mxu1 %v1477_v50 }
 0x14a   :  { %1914 = vmatprep.subr.mxu0 %v3343_v6  ;;  %1869 = vmatprep.subr.mxu1 %v3343_v6 }
 0x14b   :  { %1809 = vmatmul.mubr.f32.gmra.mxu1 %v254_v14  ;;  %v1470_v14 = vld [vmem:[%s3333_s1 + $0xc0] sm:$0xff] }
 0x14c   :  { %1811 = vmatprep.mubr.msk.f32.mxu1 %vm2304_vm0, %v3343_v6  ;;  %1870 = vmatpush3.msra.mxu1 %v1476_v54 }
 0x14d   :  { %1871 = vmatprep.subr.mxu1 %v3343_v6 }
 0x14e   :  { %1872 = vmatpush3.msra.mxu1 %v1475_v48 }
 0x14f   :  { %1812 = vmatmul.mubr.f32.gmra.mxu1 %v255_v61  ;;  %1873 = vmatprep.subr.mxu1 %v3343_v6  ;;  %v1465_v61 = vld [vmem:[%s3333_s1 + $0x98] sm:$0xff] }
 0x150   :  { %1814 = vmatprep.mubr.msk.f32.mxu1 %vm2304_vm0, %v3343_v6  ;;  %1874 = vmatpush3.msra.mxu1 %v1474_v52 }
 0x151   :  { %1875 = vmatprep.subr.mxu1 %v3343_v6 }
 0x152   :  { %1876 = vmatpush3.msra.mxu1 %v1473_v63 }
 0x153   :  { %1815 = vmatmul.mubr.f32.gmra.mxu1 %v256_v46  ;;  %1877 = vmatprep.subr.mxu1 %v3343_v6 }
 0x154   :  { %1817 = vmatprep.mubr.msk.f32.mxu1 %vm2304_vm0, %v3343_v6  ;;  %1878 = vmatpush3.msra.mxu1 %v1472_v2 }
 0x155   :  { %1879 = vmatprep.subr.mxu1 %v3343_v6 }
 0x156   :  { %1880 = vmatpush3.msra.mxu1 %v1471_v3 }
 0x157   :  { %1818 = vmatmul.mubr.f32.gmra.mxu1 %v257_v11  ;;  %1881 = vmatprep.subr.mxu1 %v3343_v6 }
 0x158   :  { %1899 = vmatprep.mubr.msk.f32.mxu1 %vm2304_vm0, %v3343_v6  ;;  %1882 = vmatpush3.msra.mxu1 %v1470_v14 }
 0x159   :  { %1883 = vmatprep.subr.mxu1 %v3343_v6 }
 0x15a   :  { %1884 = vmatpush3.msra.mxu1 %v1469_v60 }
 0x15b   :  { %1885 = vmatprep.subr.mxu1 %v3343_v6 }
 0x15c   :  { %1886 = vmatpush3.msra.mxu1 %v1468_v15 }
 0x15d   :  { %1887 = vmatprep.subr.mxu1 %v3343_v6 }
 0x15e   :  { %1888 = vmatpush3.msra.mxu1 %v1467_v1 }
 0x15f   :  { %1889 = vmatprep.subr.mxu1 %v3343_v6 }
 0x160   :  { %1890 = vmatpush3.msra.mxu1 %v1466_v57 }
 0x161   :  { %1891 = vmatprep.subr.mxu1 %v3343_v6 }
 0x162   :  { %1892 = vmatpush3.msra.mxu1 %v1465_v61 }
 0x163   :  { %1893 = vmatprep.subr.mxu1 %v3343_v6 }
 0x207   :  { %v324_v16 = vpop.f32.mrf.mxu1 }
 0x208   :  { %v348_v46 = vadd.f32 %v324_v16, %v2402_v17 }
 0x209   :  { %v1807_v0 = vpop.f32.mrf.mxu1 }
 0x20a   :  { %v357_v11 = vadd.f32 %v2793_v55, %v348_v46 }
 0x20b   :  { %v329_v50 = vpop.f32.mrf.mxu1 }
 0x20c   :  { %v349_v54 = vadd.f32 %v329_v50, %v2412_v18  ;;  %1853 = vmatmul.mubr.f32.vlgmr.msra.gmra.mxu0 %v357_v11  ;;  %v1478_v50 = vld [vmem:[%s3334_s2 + $0x29] ss:$0 sm:$0xff] }
 0x20d   :  { %v1810_v48 = vpop.f32.mrf.mxu1  ;;  %1855 = vmatprep.mubr.msk.f32.mxu0 %vm2304_vm0, %v3343_v6  ;;  %1915 = vmatpush3.msra.mxu0 %v2444_v22 }
 0x20e   :  { %v358_v52 = vadd.f32 %v2793_v55, %v349_v54  ;;  %1916 = vmatprep.subr.mxu0 %v3343_v6 }
 0x20f   :  { %v334_v63 = vpop.f32.mrf.mxu1  ;;  %1917 = vmatpush3.msra.mxu0 %v2450_v23 }
 0x210   :  { %v350_v17 = vadd.f32 %v334_v63, %v2420_v19  ;;  %1856 = vmatmul.mubr.f32.gmra.mxu0 %v358_v52  ;;  %1918 = vmatprep.subr.mxu0 %v3343_v6 }
 0x211   :  { %v1813_v18 = vpop.f32.mrf.mxu1  ;;  %1858 = vmatprep.mubr.msk.f32.mxu0 %vm2304_vm0, %v3343_v6  ;;  %1919 = vmatpush3.msra.mxu0 %v2456_v24 }
 0x212   :  { %v359_v22 = vadd.f32 %v2793_v55, %v350_v17  ;;  %1920 = vmatprep.subr.mxu0 %v3343_v6 }
 0x213   :  { %v339_v2 = vpop.f32.mrf.mxu1  ;;  %1921 = vmatpush3.msra.mxu0 %v2463_v25 }
 0x214   :  { %v351_v23 = vadd.f32 %v339_v2, %v2428_v20  ;;  %1859 = vmatmul.mubr.f32.gmra.mxu0 %v359_v22  ;;  %1922 = vmatprep.subr.mxu0 %v3343_v6 }
 0x215   :  { %v1816_v19 = vpop.f32.mrf.mxu1  ;;  %1861 = vmatprep.mubr.msk.f32.mxu0 %vm2304_vm0, %v3343_v6  ;;  %1923 = vmatpush3.msra.mxu0 %v2470_v26 }
 0x216   :  { %v360_v24 = vadd.f32 %v2793_v55, %v351_v23  ;;  %1924 = vmatprep.subr.mxu0 %v3343_v6 }
 0x217   :  { %v344_v3 = vpop.f32.mrf.mxu1  ;;  %1925 = vmatpush3.msra.mxu0 %v2477_v27  ;;  %v1463_v27 = vld [vmem:[%s3333_s1 + $0x88] sm:$0xff] }
 0x218   :  { %v352_v25 = vadd.f32 %v344_v3, %v2436_v21  ;;  %1862 = vmatmul.mubr.f32.gmra.mxu0 %v360_v24  ;;  %1926 = vmatprep.subr.mxu0 %v3343_v6  ;;  %v1464_v21 = vld [vmem:[%s3333_s1 + $0x90] sm:$0xff] }
 0x219   :  { %v1819_v20 = vpop.f32.mrf.mxu1  ;;  %1864 = vmatprep.mubr.msk.f32.mxu0 %vm2304_vm0, %v3343_v6  ;;  %1927 = vmatpush3.msra.mxu0 %v2484_v28  ;;  %v1462_v28 = vld [vmem:[%s3333_s1 + $0x80] sm:$0xff] }
 0x21a   :  { %v361_v26 = vadd.f32 %v2793_v55, %v352_v25  ;;  %1928 = vmatprep.subr.mxu0 %v3343_v6  ;;  %1894 = vmatpush3.msra.mxu1 %v1464_v21 }
 0x21b   :  { %1929 = vmatpush3.msra.mxu0 %v2491_v29  ;;  %1895 = vmatprep.subr.mxu1 %v3343_v6  ;;  %v2862_v29 = vld [vmem:[%s3334_s2 + $0x2c] ss:$0 sm:$0xff] }
 0x21c   :  { %1865 = vmatmul.mubr.f32.gmra.mxu0 %v361_v26  ;;  %1930 = vmatprep.subr.mxu0 %v3343_v6 }
 0x21d   :  { %1931 = vmatpush3.msra.mxu0 %v2498_v30  ;;  %1946 = vmatprep.mubr.msk.f32.mxu0 %vm2304_vm0, %v3343_v6 }
 0x21e   :  { %1932 = vmatprep.subr.mxu0 %v3343_v6  ;;  %1896 = vmatpush3.msra.mxu1 %v1463_v27 }
 0x21f   :  { %1933 = vmatpush3.msra.mxu0 %v2505_v31  ;;  %1897 = vmatprep.subr.mxu1 %v3343_v6 }
 0x220   :  { %1934 = vmatprep.subr.mxu0 %v3343_v6  ;;  %1898 = vmatpush3.msra.mxu1 %v1462_v28 }
 0x221   :  { %1935 = vmatpush3.msra.mxu0 %v2512_v32  ;;  %1961 = vmatprep.subr.mxu1 %v3343_v6 }
 0x222   :  { %1936 = vmatprep.subr.mxu0 %v3343_v6 }
 0x223   :  { %1937 = vmatpush3.msra.mxu0 %v2519_v33 }
 0x224   :  { %1938 = vmatprep.subr.mxu0 %v3343_v6 }
 0x225   :  { %1939 = vmatpush3.msra.mxu0 %v2526_v34 }
 0x226   :  { %1940 = vmatprep.subr.mxu0 %v3343_v6 }
 0x227   :  { %1941 = vmatpush3.msra.mxu0 %v2533_v35 }
 0x228   :  { %1942 = vmatprep.subr.mxu0 %v3343_v6 }
 0x229   :  { %1943 = vmatpush3.msra.mxu0 %v2540_v36 }
 0x22a   :  { %1944 = vmatprep.subr.mxu0 %v3343_v6 }
 0x22b   :  { %1945 = vmatpush3.msra.mxu0 %v2547_v37 }
 0x22c   :  { %2008 = vmatprep.subr.mxu0 %v3343_v6 }
 0x2cc   :  { %v432_v30 = vpop.f32.mrf.mxu0 }
 0x2cd   :  { %v433_v31 = vadd.f32 %v2862_v29, %v432_v30 }
 0x2ce   :  { %v1854_v32 = vpop.f32.mrf.mxu0 }
 0x2cf   :  { %v2865_v33 = vmax.f32 %v433_v31, 0.0 }
 0x2d0   :  { %v437_v34 = vpop.f32.mrf.mxu0 }
 0x2d1   :  { %v438_v35 = vadd.f32 %v2862_v29, %v437_v34  ;;  %1900 = vmatmul.mubr.f32.vlgmr.msra.gmra.mxu1 %v2865_v33 }
 0x2d2   :  { %v1857_v36 = vpop.f32.mrf.mxu0  ;;  %1902 = vmatprep.mubr.msk.f32.mxu1 %vm2304_vm0, %v3343_v6  ;;  %1962 = vmatpush3.msra.mxu1 %v2556_v38 }
 0x2d3   :  { %v2872_v37 = vmax.f32 %v438_v35, 0.0  ;;  %1963 = vmatprep.subr.mxu1 %v3343_v6 }
 0x2d4   :  { %v442_v14 = vpop.f32.mrf.mxu0  ;;  %1964 = vmatpush3.msra.mxu1 %v2561_v39 }
 0x2d5   :  { %v443_v60 = vadd.f32 %v2862_v29, %v442_v14  ;;  %1903 = vmatmul.mubr.f32.gmra.mxu1 %v2872_v37  ;;  %1965 = vmatprep.subr.mxu1 %v3343_v6 }
 0x2d6   :  { %v1860_v15 = vpop.f32.mrf.mxu0  ;;  %1905 = vmatprep.mubr.msk.f32.mxu1 %vm2304_vm0, %v3343_v6  ;;  %1966 = vmatpush3.msra.mxu1 %v2568_v40 }
 0x2d7   :  { %v2882_v38 = vmax.f32 %v443_v60, 0.0  ;;  %1967 = vmatprep.subr.mxu1 %v3343_v6 }
 0x2d8   :  { %v447_v1 = vpop.f32.mrf.mxu0  ;;  %1968 = vmatpush3.msra.mxu1 %v2575_v41 }
 0x2d9   :  { %v448_v39 = vadd.f32 %v2862_v29, %v447_v1  ;;  %1906 = vmatmul.mubr.f32.gmra.mxu1 %v2882_v38  ;;  %1969 = vmatprep.subr.mxu1 %v3343_v6 }
 0x2da   :  { %v1863_v57 = vpop.f32.mrf.mxu0  ;;  %1908 = vmatprep.mubr.msk.f32.mxu1 %vm2304_vm0, %v3343_v6  ;;  %1970 = vmatpush3.msra.mxu1 %v2582_v42 }
 0x2db   :  { %v2892_v40 = vmax.f32 %v448_v39, 0.0  ;;  %1971 = vmatprep.subr.mxu1 %v3343_v6 }
 0x2dc   :  { %v452_v61 = vpop.f32.mrf.mxu0  ;;  %1972 = vmatpush3.msra.mxu1 %v2589_v43  ;;  %v3344_v43 = vld [vmem:[#allocation5_spill] sm:$0xff] }
 0x2dd   :  { %v453_v41 = vadd.f32 %v2862_v29, %v452_v61  ;;  %1909 = vmatmul.mubr.f32.gmra.mxu1 %v2892_v40  ;;  %1973 = vmatprep.subr.mxu1 %v3343_v6 }
 0x2de   :  { %v1866_v16 = vpop.f32.mrf.mxu0  ;;  %1911 = vmatprep.mubr.msk.f32.mxu1 %vm2304_vm0, %v3343_v6  ;;  %1974 = vmatpush3.msra.mxu1 %v2596_v45  ;;  %v3345_v45 = vld [vmem:[#allocation6_spill] sm:$0xff] }
 0x2df   :  { %v2902_v42 = vmax.f32 %v453_v41, 0.0  ;;  %1975 = vmatprep.subr.mxu1 %v3343_v6 }
 0x2e0   :  { %1976 = vmatpush3.msra.mxu1 %v2603_v47 }
 0x2e1   :  { %1912 = vmatmul.mubr.f32.gmra.mxu1 %v2902_v42  ;;  %1977 = vmatprep.subr.mxu1 %v3343_v6 }
 0x2e2   :  { %1978 = vmatpush3.msra.mxu1 %v2610_v49  ;;  %1993 = vmatprep.mubr.msk.f32.mxu1 %vm2304_vm0, %v3343_v6 }
 0x2e3   :  { %1979 = vmatprep.subr.mxu1 %v3343_v6 }
 0x2e4   :  { %1980 = vmatpush3.msra.mxu1 %v2617_v51 }
 0x2e5   :  { %1981 = vmatprep.subr.mxu1 %v3343_v6 }
 0x2e6   :  { %1982 = vmatpush3.msra.mxu1 %v2624_v53 }
 0x2e7   :  { %1983 = vmatprep.subr.mxu1 %v3343_v6 }
 0x2e8   :  { %1984 = vmatpush3.msra.mxu1 %v3344_v43 }
 0x2e9   :  { %1985 = vmatprep.subr.mxu1 %v3343_v6 }
 0x2ea   :  { %1986 = vmatpush3.msra.mxu1 %v3345_v45 }
 0x2eb   :  { %1987 = vmatprep.subr.mxu1 %v3343_v6 }
 0x2ec   :  { %1988 = vmatpush3.msra.mxu1 %v2720_v4 }
 0x2ed   :  { %1989 = vmatprep.subr.mxu1 %v3343_v6 }
 0x2ee   :  { %1990 = vmatpush3.msra.mxu1 %v2726_v9 }
 0x2ef   :  { %1991 = vmatprep.subr.mxu1 %v3343_v6 }
 0x2f0   :  { %1992 = vmatpush3.msra.mxu1 %v2734_v13 }
 0x2f1   :  { %2055 = vmatprep.subr.mxu1 %v3343_v6 }
 0x391   :  { %v549_v47 = vpop.f32.mrf.mxu1 }
 0x392   :  { %v550_v52 = vadd.f32 %v1478_v50, %v549_v47 }
 0x393   :  { %v1901_v49 = vpop.f32.mrf.mxu1 }
 0x395   :  { %v554_v51 = vpop.f32.mrf.mxu1 }
 0x396   :  { %v555_v22 = vadd.f32 %v1478_v50, %v554_v51 }
 0x397   :  { %v1904_v53 = vpop.f32.mrf.mxu1 }
 0x399   :  { %v559_v46 = vpop.f32.mrf.mxu1 }
 0x39a   :  { %v560_v2 = vadd.f32 %v1478_v50, %v559_v46 }
 0x39b   :  { %v1907_v0 = vpop.f32.mrf.mxu1 }
 0x39d   :  { %v564_v11 = vpop.f32.mrf.mxu1 }
 0x39e   :  { %v565_v63 = vadd.f32 %v1478_v50, %v564_v11 }
 0x39f   :  { %v1910_v54 = vpop.f32.mrf.mxu1 }
 0x3a0   :  { %v575_v19 = vmax.f32 %v560_v2, %v565_v63 }
 0x3a1   :  { %v569_v48 = vpop.f32.mrf.mxu1 }
 0x3a2   :  { %v570_v17 = vadd.f32 %v1478_v50, %v569_v48 }
 0x3a3   :  { %v1913_v18 = vpop.f32.mrf.mxu1 }
 0x3a4   :  { %v573_v23 = vmax.f32 %v550_v52, %v570_v17 }
 0x3a6   :  { %v574_v24 = vmax.f32 %v573_v23, %v555_v22 }
 0x3a8   :  { %v576_v3 = vmax.f32 %v574_v24, %v575_v19 }
 0x3aa   :  { %v577_v25 = vrot.slane %v576_v3, 4 }
 0x3ac   :  { %v578_v20 = vmax.f32 %v576_v3, %v577_v25 }
 0x3ae   :  { %v579_v26 = vrot.slane %v578_v20, 2 }
 0x3b0   :  { %v580_v21 = vmax.f32 %v578_v20, %v579_v26 }
 0x3b2   :  { %v581_v27 = vrot.slane %v580_v21, 1 }
 0x3b4   :  { %v582_v28 = vmax.f32 %v580_v21, %v581_v27 }
 0x3b6   :  { %v583_v30 = vsub.f32 %v550_v52, %v582_v28  ;;  %v584_v31 = vsub.f32 %v555_v22, %v582_v28  ;;  %v585_v32 = vsub.f32 %v560_v2, %v582_v28  ;;  %v586_v34 = vsub.f32 %v565_v63, %v582_v28 }
 0x3b7   :  { %v587_v35 = vsub.f32 %v570_v17, %v582_v28 }
 0x3b8   :  { %v588_v36 = vmul.f32 1.442695, %v583_v30  ;;  %v590_v14 = vmul.f32 1.442695, %v584_v31  ;;  %v592_v60 = vmul.f32 1.442695, %v585_v32 }
 0x3b9   :  { %v594_v15 = vmul.f32 1.442695, %v586_v34  ;;  %v596_v1 = vmul.f32 1.442695, %v587_v35 }
 0x3ba   :  { %2214 = vpow2.f32 %v588_v36 }
 0x3bb   :  { %2216 = vpow2.f32 %v590_v14 }
 0x3bc   :  { %2218 = vpow2.f32 %v592_v60 }
 0x3bd   :  { %2220 = vpow2.f32 %v594_v15 }
 0x3be   :  { %2222 = vpow2.f32 %v596_v1 }
 0x3c7   :  { %v2215_v39 = vpop.eup %2214 }
 0x3c8   :  { %v2217_v57 = vpop.eup %2216  ;;  %v598_v61 = vmul.f32 %v2215_v39, %v2650_v58 }
 0x3c9   :  { %v2219_v41 = vpop.eup %2218  ;;  %v599_v16 = vmul.f32 %v2217_v57, %v2655_v59  ;;  %v613_v43 = vadd.f32 %v2217_v57, %v2215_v39 }
 0x3ca   :  { %v2221_v45 = vpop.eup %2220  ;;  %v600_v47 = vmul.f32 %v2219_v41, %v2660_v62 }
 0x3cb   :  { %v603_v49 = vadd.f32 %v599_v16, %v598_v61  ;;  %v614_v51 = vadd.f32 %v2219_v41, %v613_v43  ;;  %v2223_v53 = vpop.eup %2222  ;;  %v601_v46 = vmul.f32 %v2221_v45, %v2667_v5 }
 0x3cc   :  { %v602_v50 = vmul.f32 %v2223_v53, %v2673_v10 }
 0x3cd   :  { %v604_v0 = vadd.f32 %v603_v49, %v600_v47  ;;  %v615_v11 = vadd.f32 %v2221_v45, %v614_v51 }
 0x3cf   :  { %v605_v54 = vadd.f32 %v604_v0, %v601_v46  ;;  %v616_v48 = vadd.f32 %v2223_v53, %v615_v11  ;;  %v1493_v0 = vld [vmem:[%s3333_s1 + $0x170] sm:$0xff]  ;;  %v1491_v11 = vld [vmem:[%s3333_s1 + $0x160] sm:$0xff] }
 0x3d1   :  { %v606_v52 = vadd.f32 %v605_v54, %v602_v50  ;;  %v617_v63 = vrot.slane %v616_v48, 4  ;;  %v1490_v50 = vld [vmem:[%s3333_s1 + $0x158] sm:$0xff]  ;;  %v1489_v54 = vld [vmem:[%s3333_s1 + $0x150] sm:$0xff] }
 0x3d3   :  { %v607_v17 = vrot.slane %v606_v52, 4  ;;  %v618_v18 = vadd.f32 %v617_v63, %v616_v48  ;;  %v1488_v48 = vld [vmem:[%s3333_s1 + $0x148] sm:$0xff]  ;;  %v1486_v63 = vld [vmem:[%s3333_s1 + $0x138] sm:$0xff] }
 0x3d5   :  { %v608_v22 = vadd.f32 %v607_v17, %v606_v52  ;;  %v619_v2 = vrot.slane %v618_v18, 2  ;;  %v1487_v52 = vld [vmem:[%s3333_s1 + $0x140] sm:$0xff]  ;;  %v1485_v17 = vld [vmem:[%s3333_s1 + $0x130] sm:$0xff] }
 0x3d7   :  { %v609_v23 = vrot.slane %v608_v22, 2  ;;  %v620_v19 = vadd.f32 %v619_v2, %v618_v18  ;;  %v1484_v18 = vld [vmem:[%s3333_s1 + $0x128] sm:$0xff]  ;;  %v1482_v2 = vld [vmem:[%s3333_s1 + $0x118] sm:$0xff] }
 0x3d9   :  { %v610_v24 = vadd.f32 %v609_v23, %v608_v22  ;;  %v621_v3 = vrot.slane %v620_v19, 1  ;;  %v1483_v22 = vld [vmem:[%s3333_s1 + $0x120] sm:$0xff] }
 0x3db   :  { %v611_v25 = vrot.slane %v610_v24, 1  ;;  %v622_v26 = vadd.f32 %v621_v3, %v620_v19 }
 0x3dd   :  { %v612_v20 = vadd.f32 %v611_v25, %v610_v24 }
 0x3df   :  { %v623_v21 = vsub.f32 %v622_v26, %v612_v20  ;;  %2224 = vrcp.f32 %v612_v20 }
 0x3e1   :  { %2226 = vrcp.f32 %v623_v21  ;;  %v2246_v21 = vld [vmem:[%s3333_s1 + $0x1f8] sm:$0xff] }
 0x3ec   :  { %v2225_v27 = vpop.eup %2224 }
 0x3ed   :  { %v625_v30 = vmul.f32 %v2225_v27, %v2650_v58  ;;  %v626_v32 = vmul.f32 %v2225_v27, %v2655_v59  ;;  %v627_v15 = vmul.f32 %v2225_v27, %v2660_v62  ;;  %v628_v58 = vmul.f32 %v2225_v27, %v2667_v5 }
 0x3ee   :  { %v2227_v28 = vpop.eup %2226  ;;  %v629_v62 = vmul.f32 %v2225_v27, %v2673_v10 }
 0x3ef   :  { %v631_v31 = vmul.f32 %v2227_v28, %v2678_v7  ;;  %v632_v34 = vmul.f32 %v2227_v28, %v2681_v8  ;;  %v633_v14 = vmul.f32 %v2227_v28, %v2684_v12  ;;  %v634_v43 = vmul.f32 %v2227_v28, %v2692_v44 }
 0x3f1   :  { %v636_v35 = vadd.f32 %v631_v31, %v625_v30  ;;  %v637_v36 = vadd.f32 %v632_v34, %v626_v32  ;;  %v638_v16 = vadd.f32 %v633_v14, %v627_v15  ;;  %v639_v49 = vadd.f32 %v634_v43, %v628_v58  ;;  %v2248_v31 = vld [vmem:[%s3333_s1 + $0x1e8] sm:$0xff]  ;;  %v2250_v14 = vld [vmem:[%s3333_s1 + $0x1d8] sm:$0xff] }
 0x3f2   :  { %v2254_v58 = vld [vmem:[%s3333_s1 + $0x1b8] sm:$0xff] }
 0x3f3   :  { %v641_v60 = vmul.f32 %v2215_v39, %v636_v35  ;;  %v642_v61 = vmul.f32 %v2217_v57, %v637_v36  ;;  %v643_v47 = vmul.f32 %v2219_v41, %v638_v16  ;;  %v635_v39 = vmul.f32 %v2227_v28, %v2696_v56  ;;  %v2247_v28 = vld [vmem:[%s3333_s1 + $0x1f0] sm:$0xff]  ;;  %v2252_v16 = vld [vmem:[%s3333_s1 + $0x1c8] sm:$0xff] }
 0x3f4   :  { %v644_v51 = vmul.f32 %v2221_v45, %v639_v49  ;;  %v1494_v45 = vld [vmem:[%s3333_s1 + $0x178] sm:$0xff] }
 0x3f5   :  { %v646_v1 = vmul.f32 %v641_v60, %v2865_v33  ;;  %v647_v59 = vmul.f32 %v642_v61, %v2872_v37  ;;  %v648_v57 = vmul.f32 %v643_v47, %v2882_v38  ;;  %v640_v46 = vadd.f32 %v635_v39, %v629_v62  ;;  %v2257_v47 = vld [vmem:[%s3333_s1 + $0x1a0] sm:$0xff]  ;;  %v2258_v49 = vld [vmem:[%s3333_s1 + $0x198] sm:$0xff]  ;;  %v2259_v39 = vld [vmem:[%s3333_s1 + $0x190] sm:$0xff] }
 0x3f6   :  { %v649_v5 = vmul.f32 %v644_v51, %v2892_v40  ;;  %v2260_v62 = vld [vmem:[%s3333_s1 + $0x188] sm:$0xff]  ;;  %v1481_v51 = vld [vmem:[%s3333_s1 + $0x110] sm:$0xff] }
 0x3f7   :  { %1947 = vmatmul.mubr.f32.vlgmr.msra.gmra.mxu0 %v646_v1  ;;  %v645_v41 = vmul.f32 %v2223_v53, %v640_v46  ;;  %v1492_v53 = vld [vmem:[%s3333_s1 + $0x168] sm:$0xff] }
 0x3f8   :  { %1949 = vmatprep.mubr.msk.f32.mxu0 %vm2304_vm0, %v3343_v6  ;;  %2009 = vmatpush3.msra.mxu0 %v1494_v45  ;;  %v1480_v46 = vld [vmem:[%s3333_s1 + $0x108] sm:$0xff] }
 0x3f9   :  { %v650_v10 = vmul.f32 %v645_v41, %v2902_v42  ;;  %2010 = vmatprep.subr.mxu0 %v3343_v6 }
 0x3fa   :  { %2011 = vmatpush3.msra.mxu0 %v1493_v0 }
 0x3fb   :  { %1950 = vmatmul.mubr.f32.gmra.mxu0 %v647_v59  ;;  %2012 = vmatprep.subr.mxu0 %v3343_v6  ;;  %v2256_v59 = vld [vmem:[%s3333_s1 + $0x1a8] sm:$0xff] }
 0x3fc   :  { %1952 = vmatprep.mubr.msk.f32.mxu0 %vm2304_vm0, %v3343_v6  ;;  %2013 = vmatpush3.msra.mxu0 %v1492_v53 }
 0x3fd   :  { %2014 = vmatprep.subr.mxu0 %v3343_v6 }
 0x3fe   :  { %2015 = vmatpush3.msra.mxu0 %v1491_v11 }
 0x3ff   :  { %1953 = vmatmul.mubr.f32.gmra.mxu0 %v648_v57  ;;  %2016 = vmatprep.subr.mxu0 %v3343_v6  ;;  %v2261_v57 = vld [vmem:[%s3333_s1 + $0x180] sm:$0xff] }
 0x400   :  { %1955 = vmatprep.mubr.msk.f32.mxu0 %vm2304_vm0, %v3343_v6  ;;  %2017 = vmatpush3.msra.mxu0 %v1490_v50 }
 0x401   :  { %2018 = vmatprep.subr.mxu0 %v3343_v6 }
 0x402   :  { %2019 = vmatpush3.msra.mxu0 %v1489_v54  ;;  %v2262_v54 = vld [vmem:[%s3333_s1 + $0x278] sm:$0xff] }
 0x403   :  { %1956 = vmatmul.mubr.f32.gmra.mxu0 %v649_v5  ;;  %2020 = vmatprep.subr.mxu0 %v3343_v6  ;;  %v1479_v5 = vld [vmem:[%s3333_s1 + $0x100] sm:$0xff] }
 0x404   :  { %1958 = vmatprep.mubr.msk.f32.mxu0 %vm2304_vm0, %v3343_v6  ;;  %2021 = vmatpush3.msra.mxu0 %v1488_v48 }
 0x405   :  { %2022 = vmatprep.subr.mxu0 %v3343_v6 }
 0x406   :  { %2023 = vmatpush3.msra.mxu0 %v1487_v52 }
 0x407   :  { %1959 = vmatmul.mubr.f32.gmra.mxu0 %v650_v10  ;;  %2024 = vmatprep.subr.mxu0 %v3343_v6 }
 0x408   :  { %2040 = vmatprep.mubr.msk.f32.mxu0 %vm2304_vm0, %v3343_v6  ;;  %2025 = vmatpush3.msra.mxu0 %v1486_v63  ;;  %v2263_v63 = vld [vmem:[%s3333_s1 + $0x270] sm:$0xff] }
 0x409   :  { %2026 = vmatprep.subr.mxu0 %v3343_v6 }
 0x40a   :  { %2027 = vmatpush3.msra.mxu0 %v1485_v17 }
 0x40b   :  { %2028 = vmatprep.subr.mxu0 %v3343_v6 }
 0x40c   :  { %2029 = vmatpush3.msra.mxu0 %v1484_v18 }
 0x40d   :  { %2030 = vmatprep.subr.mxu0 %v3343_v6 }
 0x40e   :  { %2031 = vmatpush3.msra.mxu0 %v1483_v22  ;;  %v2264_v22 = vld [vmem:[%s3333_s1 + $0x268] sm:$0xff] }
 0x40f   :  { %2032 = vmatprep.subr.mxu0 %v3343_v6 }
 0x410   :  { %2033 = vmatpush3.msra.mxu0 %v1482_v2 }
 0x411   :  { %2034 = vmatprep.subr.mxu0 %v3343_v6 }
 0x412   :  { %2035 = vmatpush3.msra.mxu0 %v1481_v51 }
 0x413   :  { %2036 = vmatprep.subr.mxu0 %v3343_v6 }
 0x414   :  { %2037 = vmatpush3.msra.mxu0 %v1480_v46 }
 0x415   :  { %2038 = vmatprep.subr.mxu0 %v3343_v6 }
 0x416   :  { %2039 = vmatpush3.msra.mxu0 %v1479_v5 }
 0x417   :  { %2102 = vmatprep.subr.mxu0 %v3343_v6 }
 0x4b7   :  { %v717_v23 = vpop.f32.mrf.mxu0 }
 0x4b8   :  { %v741_v19 = vadd.f32 %v717_v23, %v2865_v33 }
 0x4b9   :  { %v1948_v24 = vpop.f32.mrf.mxu0 }
 0x4ba   :  { %v746_v3 = vadd.f32 %v2793_v55, %v741_v19  ;;  %v2265_v19 = vld [vmem:[%s3333_s1 + $0x260] sm:$0xff] }
 0x4bb   :  { %v722_v25 = vpop.f32.mrf.mxu0 }
 0x4bc   :  { %v742_v20 = vadd.f32 %v722_v25, %v2872_v37  ;;  %1994 = vmatmul.mubr.f32.vlgmr.msra.gmra.mxu1 %v746_v3  ;;  %v2266_v25 = vld [vmem:[%s3333_s1 + $0x258] sm:$0xff] }
 0x4bd   :  { %v1951_v26 = vpop.f32.mrf.mxu0  ;;  %1996 = vmatprep.mubr.msk.f32.mxu1 %vm2304_vm0, %v3343_v6  ;;  %2056 = vmatpush3.msra.mxu1 %v2246_v21  ;;  %v2267_v21 = vld [vmem:[%s3333_s1 + $0x250] sm:$0xff] }
 0x4be   :  { %v747_v27 = vadd.f32 %v2793_v55, %v742_v20  ;;  %2057 = vmatprep.subr.mxu1 %v3343_v6 }
 0x4bf   :  { %v727_v33 = vpop.f32.mrf.mxu0  ;;  %2058 = vmatpush3.msra.mxu1 %v2247_v28  ;;  %v2268_v28 = vld [vmem:[%s3333_s1 + $0x248] sm:$0xff] }
 0x4c0   :  { %v743_v37 = vadd.f32 %v727_v33, %v2882_v38  ;;  %1997 = vmatmul.mubr.f32.gmra.mxu1 %v747_v27  ;;  %2059 = vmatprep.subr.mxu1 %v3343_v6  ;;  %v2249_v38 = vld [vmem:[%s3333_s1 + $0x1e0] sm:$0xff] }
 0x4c1   :  { %v1954_v30 = vpop.f32.mrf.mxu0  ;;  %1999 = vmatprep.mubr.msk.f32.mxu1 %vm2304_vm0, %v3343_v6  ;;  %2060 = vmatpush3.msra.mxu1 %v2248_v31  ;;  %v2270_v31 = vld [vmem:[%s3333_s1 + $0x238] sm:$0xff] }
 0x4c2   :  { %v748_v32 = vadd.f32 %v2793_v55, %v743_v37  ;;  %2061 = vmatprep.subr.mxu1 %v3343_v6  ;;  %v2269_v30 = vld [vmem:[%s3333_s1 + $0x240] sm:$0xff] }
 0x4c3   :  { %v732_v34 = vpop.f32.mrf.mxu0  ;;  %2062 = vmatpush3.msra.mxu1 %v2249_v38  ;;  %v2273_v38 = vld [vmem:[%s3333_s1 + $0x220] sm:$0xff] }
 0x4c4   :  { %v744_v35 = vadd.f32 %v732_v34, %v2892_v40  ;;  %2000 = vmatmul.mubr.f32.gmra.mxu1 %v748_v32  ;;  %2063 = vmatprep.subr.mxu1 %v3343_v6  ;;  %v2251_v40 = vld [vmem:[%s3333_s1 + $0x1d0] sm:$0xff]  ;;  %v2272_v34 = vld [vmem:[%s3333_s1 + $0x228] sm:$0xff] }
 0x4c5   :  { %v1957_v36 = vpop.f32.mrf.mxu0  ;;  %2002 = vmatprep.mubr.msk.f32.mxu1 %vm2304_vm0, %v3343_v6  ;;  %2064 = vmatpush3.msra.mxu1 %v2250_v14  ;;  %v2271_v32 = vld [vmem:[%s3333_s1 + $0x230] sm:$0xff] }
 0x4c6   :  { %v749_v60 = vadd.f32 %v2793_v55, %v744_v35  ;;  %2065 = vmatprep.subr.mxu1 %v3343_v6  ;;  %v2274_v35 = vld [vmem:[%s3333_s1 + $0x218] sm:$0xff] }
 0x4c7   :  { %v737_v15 = vpop.f32.mrf.mxu0  ;;  %2066 = vmatpush3.msra.mxu1 %v2251_v40 }
 0x4c8   :  { %v745_v1 = vadd.f32 %v737_v15, %v2902_v42  ;;  %2003 = vmatmul.mubr.f32.gmra.mxu1 %v749_v60  ;;  %2067 = vmatprep.subr.mxu1 %v3343_v6  ;;  %v2253_v42 = vld [vmem:[%s3333_s1 + $0x1c0] sm:$0xff] }
 0x4c9   :  { %v1960_v61 = vpop.f32.mrf.mxu0  ;;  %2005 = vmatprep.mubr.msk.f32.mxu1 %vm2304_vm0, %v3343_v6  ;;  %2068 = vmatpush3.msra.mxu1 %v2252_v16  ;;  %v1495_v16 = vld [vmem:[%s3334_s2 + $0x2a] ss:$0 sm:$0xff] }
 0x4ca   :  { %v750_v43 = vadd.f32 %v2793_v55, %v745_v1  ;;  %2069 = vmatprep.subr.mxu1 %v3343_v6  ;;  %v2255_v55 = vld [vmem:[%s3333_s1 + $0x1b0] sm:$0xff] }
 0x4cb   :  { %2070 = vmatpush3.msra.mxu1 %v2253_v42 }
 0x4cc   :  { %2006 = vmatmul.mubr.f32.gmra.mxu1 %v750_v43  ;;  %2071 = vmatprep.subr.mxu1 %v3343_v6 }
 0x4cd   :  { %2072 = vmatpush3.msra.mxu1 %v2254_v58  ;;  %2087 = vmatprep.mubr.msk.f32.mxu1 %vm2304_vm0, %v3343_v6 }
 0x4ce   :  { %2073 = vmatprep.subr.mxu1 %v3343_v6 }
 0x4cf   :  { %2074 = vmatpush3.msra.mxu1 %v2255_v55 }
 0x4d0   :  { %2075 = vmatprep.subr.mxu1 %v3343_v6 }
 0x4d1   :  { %2076 = vmatpush3.msra.mxu1 %v2256_v59 }
 0x4d2   :  { %2077 = vmatprep.subr.mxu1 %v3343_v6 }
 0x4d3   :  { %2078 = vmatpush3.msra.mxu1 %v2257_v47 }
 0x4d4   :  { %2079 = vmatprep.subr.mxu1 %v3343_v6 }
 0x4d5   :  { %2080 = vmatpush3.msra.mxu1 %v2258_v49 }
 0x4d6   :  { %2081 = vmatprep.subr.mxu1 %v3343_v6 }
 0x4d7   :  { %2082 = vmatpush3.msra.mxu1 %v2259_v39 }
 0x4d8   :  { %2083 = vmatprep.subr.mxu1 %v3343_v6 }
 0x4d9   :  { %2084 = vmatpush3.msra.mxu1 %v2260_v62 }
 0x4da   :  { %2085 = vmatprep.subr.mxu1 %v3343_v6 }
 0x4db   :  { %2086 = vmatpush3.msra.mxu1 %v2261_v57 }
 0x4dc   :  { %2149 = vmatprep.subr.mxu1 %v3343_v6 }
 0x57c   :  { %v817_v41 = vpop.f32.mrf.mxu1 }
 0x57d   :  { %v818_v10 = vadd.f32 %v2862_v29, %v817_v41 }
 0x57e   :  { %v1995_v45 = vpop.f32.mrf.mxu1 }
 0x57f   :  { %v3108_v0 = vmax.f32 %v818_v10, 0.0 }
 0x580   :  { %v822_v53 = vpop.f32.mrf.mxu1 }
 0x581   :  { %v823_v11 = vadd.f32 %v2862_v29, %v822_v53  ;;  %2041 = vmatmul.mubr.f32.vlgmr.msra.gmra.mxu0 %v3108_v0 }
 0x582   :  { %v1998_v50 = vpop.f32.mrf.mxu1  ;;  %2043 = vmatprep.mubr.msk.f32.mxu0 %vm2304_vm0, %v3343_v6  ;;  %2103 = vmatpush3.msra.mxu0 %v2262_v54 }
 0x583   :  { %v3117_v48 = vmax.f32 %v823_v11, 0.0  ;;  %2104 = vmatprep.subr.mxu0 %v3343_v6 }
 0x584   :  { %v827_v52 = vpop.f32.mrf.mxu1  ;;  %2105 = vmatpush3.msra.mxu0 %v2263_v63 }
 0x585   :  { %v828_v17 = vadd.f32 %v2862_v29, %v827_v52  ;;  %2044 = vmatmul.mubr.f32.gmra.mxu0 %v3117_v48  ;;  %2106 = vmatprep.subr.mxu0 %v3343_v6 }
 0x586   :  { %v2001_v18 = vpop.f32.mrf.mxu1  ;;  %2046 = vmatprep.mubr.msk.f32.mxu0 %vm2304_vm0, %v3343_v6  ;;  %2107 = vmatpush3.msra.mxu0 %v2264_v22 }
 0x587   :  { %v3131_v2 = vmax.f32 %v828_v17, 0.0  ;;  %2108 = vmatprep.subr.mxu0 %v3343_v6 }
 0x588   :  { %v832_v23 = vpop.f32.mrf.mxu1  ;;  %2109 = vmatpush3.msra.mxu0 %v2265_v19 }
 0x589   :  { %v833_v24 = vadd.f32 %v2862_v29, %v832_v23  ;;  %2047 = vmatmul.mubr.f32.gmra.mxu0 %v3131_v2  ;;  %2110 = vmatprep.subr.mxu0 %v3343_v6 }
 0x58a   :  { %v2004_v3 = vpop.f32.mrf.mxu1  ;;  %2049 = vmatprep.mubr.msk.f32.mxu0 %vm2304_vm0, %v3343_v6  ;;  %2111 = vmatpush3.msra.mxu0 %v2266_v25 }
 0x58b   :  { %v3145_v20 = vmax.f32 %v833_v24, 0.0  ;;  %2112 = vmatprep.subr.mxu0 %v3343_v6  ;;  %v2275_v24 = vld [vmem:[%s3334_s2] sm:$0xff] }
 0x58c   :  { %v837_v26 = vpop.f32.mrf.mxu1  ;;  %2113 = vmatpush3.msra.mxu0 %v2267_v21 }
 0x58d   :  { %v838_v27 = vadd.f32 %v2862_v29, %v837_v26  ;;  %2050 = vmatmul.mubr.f32.gmra.mxu0 %v3145_v20  ;;  %2114 = vmatprep.subr.mxu0 %v3343_v6  ;;  %v2276_v26 = vld [vmem:[%s3334_s2 + $0x8] sm:$0xff] }
 0x58e   :  { %v2007_v33 = vpop.f32.mrf.mxu1  ;;  %2052 = vmatprep.mubr.msk.f32.mxu0 %vm2304_vm0, %v3343_v6  ;;  %2115 = vmatpush3.msra.mxu0 %v2268_v28  ;;  %v2277_v28 = vld [vmem:[%s3334_s2 + $0x10] sm:$0xff] }
 0x58f   :  { %v3159_v37 = vmax.f32 %v838_v27, 0.0  ;;  %2116 = vmatprep.subr.mxu0 %v3343_v6 }
 0x590   :  { %2117 = vmatpush3.msra.mxu0 %v2269_v30 }
 0x591   :  { %2053 = vmatmul.mubr.f32.gmra.mxu0 %v3159_v37  ;;  %2118 = vmatprep.subr.mxu0 %v3343_v6 }
 0x592   :  { %2119 = vmatpush3.msra.mxu0 %v2270_v31  ;;  %2134 = vmatprep.mubr.msk.f32.mxu0 %vm2304_vm0, %v3343_v6 }
 0x593   :  { %2120 = vmatprep.subr.mxu0 %v3343_v6 }
 0x594   :  { %2121 = vmatpush3.msra.mxu0 %v2271_v32 }
 0x595   :  { %2122 = vmatprep.subr.mxu0 %v3343_v6 }
 0x596   :  { %2123 = vmatpush3.msra.mxu0 %v2272_v34 }
 0x597   :  { %2124 = vmatprep.subr.mxu0 %v3343_v6 }
 0x598   :  { %2125 = vmatpush3.msra.mxu0 %v2273_v38  ;;  %v2278_v38 = vld [vmem:[%s3334_s2 + $0x18] sm:$0xff] }
 0x599   :  { %2126 = vmatprep.subr.mxu0 %v3343_v6 }
 0x59a   :  { %2127 = vmatpush3.msra.mxu0 %v2274_v35 }
 0x59b   :  { %2128 = vmatprep.subr.mxu0 %v3343_v6 }
 0x59c   :  { %2129 = vmatpush3.msra.mxu0 %v2720_v4 }
 0x59d   :  { %2130 = vmatprep.subr.mxu0 %v3343_v6 }
 0x59e   :  { %2131 = vmatpush3.msra.mxu0 %v2726_v9 }
 0x59f   :  { %2132 = vmatprep.subr.mxu0 %v3343_v6 }
 0x5a0   :  { %2133 = vmatpush3.msra.mxu0 %v2734_v13 }
 0x641   :  { %v934_v36 = vpop.f32.mrf.mxu0 }
 0x642   :  { %v935_v42 = vadd.f32 %v1495_v16, %v934_v36 }
 0x643   :  { %v2042_v14 = vpop.f32.mrf.mxu0 }
 0x645   :  { %v939_v60 = vpop.f32.mrf.mxu0 }
 0x646   :  { %v940_v59 = vadd.f32 %v1495_v16, %v939_v60  ;;  %v2279_v60 = vld [vmem:[%s3334_s2 + $0x20] sm:$0xff] }
 0x647   :  { %v2045_v15 = vpop.f32.mrf.mxu0 }
 0x649   :  { %v944_v40 = vpop.f32.mrf.mxu0 }
 0x64a   :  { %v945_v47 = vadd.f32 %v1495_v16, %v944_v40 }
 0x64b   :  { %v2048_v1 = vpop.f32.mrf.mxu0 }
 0x64d   :  { %v949_v61 = vpop.f32.mrf.mxu0 }
 0x64e   :  { %v950_v58 = vadd.f32 %v1495_v16, %v949_v61 }
 0x64f   :  { %v2051_v4 = vpop.f32.mrf.mxu0 }
 0x650   :  { %v960_v49 = vmax.f32 %v945_v47, %v950_v58 }
 0x651   :  { %v954_v43 = vpop.f32.mrf.mxu0 }
 0x652   :  { %v955_v9 = vadd.f32 %v1495_v16, %v954_v43 }
 0x653   :  { %v2054_v55 = vpop.f32.mrf.mxu0 }
 0x654   :  { %v958_v13 = vmax.f32 %v935_v42, %v955_v9 }
 0x656   :  { %v959_v39 = vmax.f32 %v958_v13, %v940_v59 }
 0x658   :  { %v961_v62 = vmax.f32 %v959_v39, %v960_v49 }
 0x65a   :  { %v962_v57 = vrot.slane %v961_v62, 4 }
 0x65c   :  { %v963_v51 = vmax.f32 %v961_v62, %v962_v57 }
 0x65e   :  { %v964_v46 = vrot.slane %v963_v51, 2 }
 0x660   :  { %v965_v5 = vmax.f32 %v963_v51, %v964_v46 }
 0x662   :  { %v966_v41 = vrot.slane %v965_v5, 1 }
 0x664   :  { %v967_v10 = vmax.f32 %v965_v5, %v966_v41 }
 0x666   :  { %v968_v45 = vsub.f32 %v935_v42, %v967_v10  ;;  %v969_v53 = vsub.f32 %v940_v59, %v967_v10  ;;  %v970_v11 = vsub.f32 %v945_v47, %v967_v10  ;;  %v971_v50 = vsub.f32 %v950_v58, %v967_v10 }
 0x667   :  { %v972_v54 = vsub.f32 %v955_v9, %v967_v10 }
 0x668   :  { %v973_v52 = vmul.f32 1.442695, %v968_v45  ;;  %v975_v63 = vmul.f32 1.442695, %v969_v53  ;;  %v977_v17 = vmul.f32 1.442695, %v970_v11 }
 0x669   :  { %v979_v18 = vmul.f32 1.442695, %v971_v50  ;;  %v981_v22 = vmul.f32 1.442695, %v972_v54 }
 0x66a   :  { %2228 = vpow2.f32 %v973_v52 }
 0x66b   :  { %2230 = vpow2.f32 %v975_v63 }
 0x66c   :  { %2232 = vpow2.f32 %v977_v17 }
 0x66d   :  { %2234 = vpow2.f32 %v979_v18 }
 0x66e   :  { %2236 = vpow2.f32 %v981_v22 }
 0x677   :  { %v2229_v23 = vpop.eup %2228 }
 0x678   :  { %v2231_v19 = vpop.eup %2230  ;;  %v983_v3 = vmul.f32 %v2275_v24, %v2229_v23 }
 0x679   :  { %v2233_v25 = vpop.eup %2232  ;;  %v984_v21 = vmul.f32 %v2276_v26, %v2231_v19  ;;  %v998_v27 = vadd.f32 %v2231_v19, %v2229_v23 }
 0x67a   :  { %v2235_v33 = vpop.eup %2234  ;;  %v985_v30 = vmul.f32 %v2277_v28, %v2233_v25 }
 0x67b   :  { %v988_v31 = vadd.f32 %v984_v21, %v983_v3  ;;  %v999_v32 = vadd.f32 %v2233_v25, %v998_v27  ;;  %v2237_v34 = vpop.eup %2236  ;;  %v986_v35 = vmul.f32 %v2278_v38, %v2235_v33 }
 0x67c   :  { %v987_v15 = vmul.f32 %v2279_v60, %v2237_v34 }
 0x67d   :  { %v989_v36 = vadd.f32 %v988_v31, %v985_v30  ;;  %v1000_v14 = vadd.f32 %v2235_v33, %v999_v32 }
 0x67f   :  { %v990_v40 = vadd.f32 %v989_v36, %v986_v35  ;;  %v1001_v1 = vadd.f32 %v2237_v34, %v1000_v14 }
 0x681   :  { %v991_v61 = vadd.f32 %v990_v40, %v987_v15  ;;  %v1002_v16 = vrot.slane %v1001_v1, 4 }
 0x683   :  { %v992_v4 = vrot.slane %v991_v61, 4  ;;  %v1003_v43 = vadd.f32 %v1002_v16, %v1001_v1 }
 0x685   :  { %v993_v42 = vadd.f32 %v992_v4, %v991_v61  ;;  %v1004_v58 = vrot.slane %v1003_v43, 2 }
 0x687   :  { %v994_v9 = vrot.slane %v993_v42, 2  ;;  %v1005_v55 = vadd.f32 %v1004_v58, %v1003_v43 }
 0x689   :  { %v995_v59 = vadd.f32 %v994_v9, %v993_v42  ;;  %v1006_v47 = vrot.slane %v1005_v55, 1 }
 0x68b   :  { %v996_v13 = vrot.slane %v995_v59, 1  ;;  %v1007_v39 = vadd.f32 %v1006_v47, %v1005_v55 }
 0x68d   :  { %v997_v49 = vadd.f32 %v996_v13, %v995_v59 }
 0x68f   :  { %v1008_v62 = vsub.f32 %v1007_v39, %v997_v49  ;;  %2238 = vrcp.f32 %v997_v49 }
 0x691   :  { %2240 = vrcp.f32 %v1008_v62 }
 0x69c   :  { %v2239_v57 = vpop.eup %2238 }
 0x69d   :  { %v1010_v46 = vmul.f32 %v2275_v24, %v2239_v57  ;;  %v1011_v41 = vmul.f32 %v2276_v26, %v2239_v57  ;;  %v1012_v54 = vmul.f32 %v2277_v28, %v2239_v57  ;;  %v1013_v22 = vmul.f32 %v2278_v38, %v2239_v57  ;;  %v2280_v28 = vld [vmem:[%s3334_s2 + $0x2b] ss:$0 sm:$0xff] }
 0x69e   :  { %v2241_v51 = vpop.eup %2240 }
 0x69f   :  { %v1016_v5 = vmul.f32 %v2241_v51, %v2678_v7  ;;  %v1017_v10 = vmul.f32 %v2241_v51, %v2681_v8  ;;  %v1018_v11 = vmul.f32 %v2241_v51, %v2684_v12  ;;  %v1019_v18 = vmul.f32 %v2241_v51, %v2692_v44 }
 0x6a0   :  { %v1020_v3 = vmul.f32 %v2241_v51, %v2696_v56  ;;  %v1014_v12 = vmul.f32 %v2279_v60, %v2239_v57 }
 0x6a1   :  { %v1021_v45 = vadd.f32 %v1016_v5, %v1010_v46  ;;  %v1022_v53 = vadd.f32 %v1017_v10, %v1011_v41  ;;  %v1023_v17 = vadd.f32 %v1018_v11, %v1012_v54  ;;  %v1024_v24 = vadd.f32 %v1019_v18, %v1013_v22  ;;  %v1510_v11 = vld [vmem:[%s3333_s1 + $0x2e8] sm:$0xff]  ;;  %v1508_v54 = vld [vmem:[%s3333_s1 + $0x2d8] sm:$0xff]  ;;  %v1503_v22 = vld [vmem:[%s3333_s1 + $0x2b0] sm:$0xff] }
 0x6a2   :  { %v1025_v44 = vadd.f32 %v1020_v3, %v1014_v12  ;;  %v1504_v18 = vld [vmem:[%s3333_s1 + $0x2b8] sm:$0xff]  ;;  %v1499_v3 = vld [vmem:[%s3333_s1 + $0x290] sm:$0xff]  ;;  %v1498_v12 = vld [vmem:[%s3333_s1 + $0x288] sm:$0xff] }
 0x6a3   :  { %v1026_v50 = vmul.f32 %v2229_v23, %v1021_v45  ;;  %v1027_v63 = vmul.f32 %v2231_v19, %v1022_v53  ;;  %v1028_v8 = vmul.f32 %v2233_v25, %v1023_v17  ;;  %v1029_v19 = vmul.f32 %v2235_v33, %v1024_v24  ;;  %v1231_v45 = vld [vmem:[%s3335_s3] sm:$0x3]  ;;  %v1511_v53 = vld [vmem:[%s3333_s1 + $0x2f0] sm:$0xff]  ;;  %v1500_v24 = vld [vmem:[%s3333_s1 + $0x298] sm:$0xff] }
 0x6a4   :  { %v1030_v21 = vmul.f32 %v2237_v34, %v1025_v44  ;;  %v1505_v17 = vld [vmem:[%s3333_s1 + $0x2c0] sm:$0xff] }
 0x6a5   :  { %v1031_v52 = vmul.f32 %v1026_v50, %v3108_v0  ;;  %v1032_v7 = vmul.f32 %v1027_v63, %v3117_v48  ;;  %v1033_v23 = vmul.f32 %v1028_v8, %v3131_v2  ;;  %v1034_v26 = vmul.f32 %v1029_v19, %v3145_v20  ;;  %v1509_v50 = vld [vmem:[%s3333_s1 + $0x2e0] sm:$0xff]  ;;  %v1506_v63 = vld [vmem:[%s3333_s1 + $0x2c8] sm:$0xff] }
 0x6a6   :  { %v1035_v56 = vmul.f32 %v1030_v21, %v3159_v37  ;;  %v1501_v8 = vld [vmem:[%s3333_s1 + $0x2a0] sm:$0xff] }
 0x6a7   :  { %2088 = vmatmul.mubr.f32.vlgmr.msra.gmra.mxu1 %v1031_v52  ;;  %v1507_v52 = vld [vmem:[%s3333_s1 + $0x2d0] sm:$0xff] }
 0x6a8   :  { %2090 = vmatprep.mubr.msk.f32.mxu1 %vm2304_vm0, %v3343_v6 }
 0x6ab   :  { %2091 = vmatmul.mubr.f32.gmra.mxu1 %v1032_v7  ;;  %v1502_v7 = vld [vmem:[%s3333_s1 + $0x2a8] sm:$0xff] }
 0x6ac   :  { %2093 = vmatprep.mubr.msk.f32.mxu1 %vm2304_vm0, %v3343_v6 }
 0x6af   :  { %2094 = vmatmul.mubr.f32.gmra.mxu1 %v1033_v23  ;;  %v1497_v23 = vld [vmem:[%s3333_s1 + $0x280] sm:$0xff] }
 0x6b0   :  { %2096 = vmatprep.mubr.msk.f32.mxu1 %vm2304_vm0, %v3343_v6 }
 0x6b3   :  { %2097 = vmatmul.mubr.f32.gmra.mxu1 %v1034_v26  ;;  %v1513_v26 = vld [vmem:[%s3334_s2 + $0x2d] ss:$0 sm:$0xff] }
 0x6b4   :  { %2099 = vmatprep.mubr.msk.f32.mxu1 %vm2304_vm0, %v3343_v6 }
 0x6b7   :  { %2100 = vmatmul.mubr.f32.gmra.mxu1 %v1035_v56 }
 0x6b8   :  { %2159 = vmatprep.mubr.msk.f32.mxu1 %vm2304_vm0, %v3343_v6 }
 0x767   :  { %v1102_v25 = vpop.f32.mrf.mxu1 }
 0x768   :  { %v1126_v27 = vadd.f32 %v1102_v25, %v3108_v0 }
 0x769   :  { %v2089_v33 = vpop.f32.mrf.mxu1 }
 0x76a   :  { %v1131_v30 = vadd.f32 %v2280_v28, %v1126_v27 }
 0x76b   :  { %v1107_v31 = vpop.f32.mrf.mxu1 }
 0x76c   :  { %v1127_v32 = vadd.f32 %v1107_v31, %v3117_v48  ;;  %2135 = vmatmul.mubr.f32.vlgmr.msra.gmra.mxu0 %v1131_v30 }
 0x76d   :  { %v2092_v34 = vpop.f32.mrf.mxu1  ;;  %2137 = vmatprep.mubr.msk.f32.mxu0 %vm2304_vm0, %v3343_v6 }
 0x76e   :  { %v1132_v38 = vadd.f32 %v2280_v28, %v1127_v32 }
 0x76f   :  { %v1112_v35 = vpop.f32.mrf.mxu1 }
 0x770   :  { %v1128_v36 = vadd.f32 %v1112_v35, %v3131_v2  ;;  %2138 = vmatmul.mubr.f32.gmra.mxu0 %v1132_v38 }
 0x771   :  { %v2095_v0 = vpop.f32.mrf.mxu1  ;;  %2140 = vmatprep.mubr.msk.f32.mxu0 %vm2304_vm0, %v3343_v6 }
 0x772   :  { %v1133_v14 = vadd.f32 %v2280_v28, %v1128_v36 }
 0x773   :  { %v1117_v60 = vpop.f32.mrf.mxu1 }
 0x774   :  { %v1129_v15 = vadd.f32 %v1117_v60, %v3145_v20  ;;  %2141 = vmatmul.mubr.f32.gmra.mxu0 %v1133_v14 }
 0x775   :  { %v2098_v48 = vpop.f32.mrf.mxu1  ;;  %2143 = vmatprep.mubr.msk.f32.mxu0 %vm2304_vm0, %v3343_v6 }
 0x776   :  { %v1134_v40 = vadd.f32 %v2280_v28, %v1129_v15 }
 0x777   :  { %v1122_v1 = vpop.f32.mrf.mxu1 }
 0x778   :  { %v1130_v61 = vadd.f32 %v1122_v1, %v3159_v37  ;;  %2144 = vmatmul.mubr.f32.gmra.mxu0 %v1134_v40 }
 0x779   :  { %v2101_v2 = vpop.f32.mrf.mxu1  ;;  %2146 = vmatprep.mubr.msk.f32.mxu0 %vm2304_vm0, %v3343_v6 }
 0x77a   :  { %v1135_v16 = vadd.f32 %v2280_v28, %v1130_v61 }
 0x77c   :  { %2147 = vmatmul.mubr.f32.gmra.mxu0 %v1135_v16 }
 0x82c   :  { %v1202_v4 = vpop.f32.mrf.mxu0 }
 0x82d   :  { %v1203_v46 = vadd.f32 %v2862_v29, %v1202_v4 }
 0x82e   :  { %v2136_v43 = vpop.f32.mrf.mxu0 }
 0x82f   :  { %v1226_v10 = vmax.f32 %v1203_v46, 0.0 }
 0x830   :  { %v1207_v42 = vpop.f32.mrf.mxu0 }
 0x831   :  { %v1208_v57 = vadd.f32 %v2862_v29, %v1207_v42 }
 0x832   :  { %v2139_v20 = vpop.f32.mrf.mxu0 }
 0x833   :  { %v1227_v41 = vmax.f32 %v1208_v57, 0.0 }
 0x834   :  { %v1212_v58 = vpop.f32.mrf.mxu0 }
 0x835   :  { %v1213_v39 = vadd.f32 %v2862_v29, %v1212_v58 }
 0x836   :  { %v2142_v9 = vpop.f32.mrf.mxu0 }
 0x837   :  { %v1228_v5 = vmax.f32 %v1213_v39, 0.0 }
 0x838   :  { %v1217_v55 = vpop.f32.mrf.mxu0 }
 0x839   :  { %v1218_v13 = vadd.f32 %v2862_v29, %v1217_v55 }
 0x83a   :  { %v2145_v59 = vpop.f32.mrf.mxu0 }
 0x83b   :  { %v1229_v51 = vmax.f32 %v1218_v13, 0.0 }
 0x83c   :  { %v1222_v47 = vpop.f32.mrf.mxu0 }
 0x83d   :  { %v1223_v37 = vadd.f32 %v2862_v29, %v1222_v47  ;;  %v1512_v29 = vld [vmem:[%s3333_s1 + $0x2f8] sm:$0xff]  ;;  %s2305_s1 = smov [#allocation2]  }
 0x83e   :  { %v2148_v49 = vpop.f32.mrf.mxu0  ;;  %s1419_s13 = sshll.u32 %s2305_s1, 4  ;;  %s1420_s13 = int_to_ptr.vmem [resolvable:$true] %s1419_s13 }
 0x83f   :  { %v1230_v62 = vmax.f32 %v1223_v37, 0.0  ;;  %s2281_s2 = scalar_lea.vmem %s1420_s13, 32  ;;  %p2286_p1 = scmp.lt.s32.totalorder %s1420_s13, %s1420_s13 }
 0x840   :  { %p2282_p0 = scmp.ne.s32.totalorder %s1420_s13, %s2281_s2  ;;  %p2287_p2 = scmp.lt.s32.totalorder %s2281_s2, %s2281_s2 }
 0x841   :  { %2150 = vmatpush3.msra.mxu1 %v1230_v62 }
 0x842   :  { %2151 = vmatprep.subr.mxu1 %v3343_v6  ;;  %p2288_p3 = por %p2287_p2, %p2286_p1 }
 0x843   :  { %2152 = vmatpush3.msra.mxu1 %v1229_v51 }
 0x844   :  { %2153 = vmatprep.subr.mxu1 %v3343_v6  ;;  %p2289_p4 = pnand %p2288_p3, %p2282_p0 }
 0x845   :  { %2154 = vmatpush3.msra.mxu1 %v1228_v5 }
 0x846   :  { %2155 = vmatprep.subr.mxu1 %v3343_v6 }
 0x847   :  { %2156 = vmatpush3.msra.mxu1 %v1227_v41 }
 0x848   :  { %2157 = vmatprep.subr.mxu1 %v3343_v6 }
 0x849   :  { %2158 = vmatpush3.msra.mxu1 %v1226_v10 }
 0x84a   :  { %2160 = vmatmul.mubr.msk.f32.vlgmr.msra.gmra.mxu1 %vm1232_vm1, %v1231_v45  ;;  %2162 = vmatprep.subr.mxu1 %v3343_v6 }
 0x84b   :  { %2163 = vmatpush3.msra.mxu1 %v1512_v29  ;;  %2194 = vmatprep.mubr.msk.f32.mxu1 %vm2304_vm0, %v3343_v6 }
 0x84c   :  { %2164 = vmatprep.subr.mxu1 %v3343_v6 }
 0x84d   :  { %2165 = vmatpush3.msra.mxu1 %v1511_v53 }
 0x84e   :  { %2166 = vmatprep.subr.mxu1 %v3343_v6 }
 0x84f   :  { %2167 = vmatpush3.msra.mxu1 %v1510_v11 }
 0x850   :  { %2168 = vmatprep.subr.mxu1 %v3343_v6 }
 0x851   :  { %2169 = vmatpush3.msra.mxu1 %v1509_v50 }
 0x852   :  { %2170 = vmatprep.subr.mxu1 %v3343_v6 }
 0x853   :  { %2171 = vmatpush3.msra.mxu1 %v1508_v54 }
 0x854   :  { %2172 = vmatprep.subr.mxu1 %v3343_v6 }
 0x855   :  { %2173 = vmatpush3.msra.mxu1 %v1507_v52 }
 0x856   :  { %2174 = vmatprep.subr.mxu1 %v3343_v6 }
 0x857   :  { %2175 = vmatpush3.msra.mxu1 %v1506_v63 }
 0x858   :  { %2176 = vmatprep.subr.mxu1 %v3343_v6 }
 0x859   :  { %2177 = vmatpush3.msra.mxu1 %v1505_v17 }
 0x85a   :  { %2178 = vmatprep.subr.mxu1 %v3343_v6 }
 0x85b   :  { %2179 = vmatpush3.msra.mxu1 %v1504_v18 }
 0x85c   :  { %2180 = vmatprep.subr.mxu1 %v3343_v6 }
 0x85d   :  { %2181 = vmatpush3.msra.mxu1 %v1503_v22 }
 0x85e   :  { %2182 = vmatprep.subr.mxu1 %v3343_v6 }
 0x85f   :  { %2183 = vmatpush3.msra.mxu1 %v1502_v7 }
 0x860   :  { %2184 = vmatprep.subr.mxu1 %v3343_v6 }
 0x861   :  { %2185 = vmatpush3.msra.mxu1 %v1501_v8 }
 0x862   :  { %2186 = vmatprep.subr.mxu1 %v3343_v6 }
 0x863   :  { %2187 = vmatpush3.msra.mxu1 %v1500_v24 }
 0x864   :  { %2188 = vmatprep.subr.mxu1 %v3343_v6 }
 0x865   :  { %2189 = vmatpush3.msra.mxu1 %v1499_v3 }
 0x866   :  { %2190 = vmatprep.subr.mxu1 %v3343_v6 }
 0x867   :  { %2191 = vmatpush3.msra.mxu1 %v1498_v12 }
 0x868   :  { %2192 = vmatprep.subr.mxu1 %v3343_v6 }
 0x869   :  { %2193 = vmatpush3.msra.mxu1 %v1497_v23 }
 0x90a   :  { %v1302_v19 = vpop.f32.mrf.mxu1 }
 0x90b   :  { %2195 = vmatmul.mubr.f32.vlgmr.msra.gmra.mxu1 %v1302_v19 }
 0x90c   :  { %v2161_v44 = vpop.f32.mrf.mxu1 }
 0x9cb   :  { %v1394_v21 = vpop.f32.mrf.mxu1 }
 0x9cc   :  { %v1395_v56 = vadd.f32 %v1513_v26, %v1394_v21 }
 0x9cd   :  { %v2196_v25 = vpop.f32.mrf.mxu1 }
 0x9ce   :  { %v1399_v27 = vsel %vm1398_vm2, %v1395_v56, -inf }
 0x9cf   :  { %1400 = vmax.xlane.f32.xlu0 %v1399_v27 }
 0xa58   :  { %v1401_v33 = vpop.xlane.xlu0 %1400 }
 0xa59   :  { %v1402_v6 = vsub.f32 %v1395_v56, %v1401_v33 }
 0xa5b   :  { %v1403_v28 = vmul.f32 1.442695, %v1402_v6 }
 0xa5d   :  { %2242 = vpow2.f32 %v1403_v28 }
 0xa6a   :  { %v2243_v30 = vpop.eup %2242 }
 0xa6b   :  { %v1405_v31 = vsel %vm1398_vm2, %v2243_v30, 0.0 }
 0xa6c   :  { %1406 = vadd.xlane.f32.xlu0 %v1405_v31 }
 0xaf5   :  { %v1407_v32 = vpop.xlane.xlu0 %1406 }
 0xaf6   :  { %2244 = vlog2.f32 %v1407_v32 }
 0xb03   :  { %v2245_v34 = vpop.eup %2244 }
 0xb04   :  { %v1409_v38 = vmul.f32 0.6931472, %v2245_v34 }
 0xb06   :  { %v1410_v35 = vadd.f32 %v1409_v38, %v1401_v33 }
 0xb08   :  { %v1411_v36 = vsub.f32 %v1395_v56, %v1410_v35 }
 0xb0a   :  { %1412 = vst [vmem:[#allocation2] sm:$0x3] %v1411_v36 }
 0xb0b   :  { %2292 = shalt.err (!%p2289_p4)
}
 0xb0c   :  { %1422 = dma.vmem_to_hbm [thread:$0]  %s1420_s13, 32, %s3336_s4, [#allocation3]  }
 0xb0d   :  { %2301 = dma.done.wait [#allocation3], 32  }
 0xb0e   :  { %2302 = vsyncadd [#allocation3], 4294967264 }
 0xb0f   :  { %1426 = vsyncpa [#allocation3], 1 }

</bundles_post_ra>
